<compile_context>
chip_gen: v7x
topology: tpu7x:2x2x1
jax: 0.10.0
libtpu: 0.0.40
codegen_flags: <defaults>
</compile_context>

<pallas_src>
import math

import jax
import jax.numpy as jnp
import numpy as np
from jax import lax
from jax.experimental import pallas as pl
from jax.experimental.pallas import tpu as pltpu

_SQRT_2_INV = 1.0 / math.sqrt(2.0)
_GN_EPS = 1e-5


def _erf_poly(x):
    # Abramowitz & Stegun 7.1.26 polynomial erf (|err| < 1.5e-7), built only
    # from ops Mosaic lowers natively.  The divide goes to the EUP via
    # pl.reciprocal(approx=True).
    a1, a2, a3, a4, a5 = (0.254829592, -0.284496736, 1.421413741,
                          -1.453152027, 1.061405429)
    p = 0.3275911
    ax = jnp.abs(x)
    t = pl.reciprocal(1.0 + p * ax, approx=True)
    poly = ((((a5 * t + a4) * t + a3) * t + a2) * t + a1) * t
    y = 1.0 - poly * jnp.exp(-ax * ax)
    return jnp.where(x >= 0.0, y, -y)


def _gelu(x):
    # exact (erf-based) GELU, matching torch.nn.GELU() default
    return 0.5 * x * (1.0 + _erf_poly(x * _SQRT_2_INV))


# ---------------------------------------------------------------------------
# Fully fused Down kernel (one grid step per sample).
# ---------------------------------------------------------------------------
def _make_down_kernel(H, W, Cin, Cout, Lflat):
    # H, W are the *pooled* spatial dims; padded grid is (H+2, W+2),
    # flattened to Lflat lanes (>= (H+2)*(W+2), multiple of 128).
    Hp, Wp = H + 2, W + 2
    offsets = [(dy - 1) * Wp + (dx - 1) for dy in range(3) for dx in range(3)]
    inv_n1 = 1.0 / float(H * W * Cin)     # GN count for convs with Cin outputs
    inv_n2 = 1.0 / float(H * W * Cout)    # GN count for convs with Cout outputs

    def kernel(x_ref, mask_ref,
               w1_ref, g1_ref, b1_ref, w2_ref, g2_ref, b2_ref,
               w3_ref, g3_ref, b3_ref, w4_ref, g4_ref, b4_ref,
               emb_ref, out_ref):
        mask = mask_ref[...]                                   # (1, Lflat) interior=1

        def conv_gn(fin, w, gamma, beta, inv_n):
            # fin: (ci, Lflat) zero-ring padded-flat map (f32).
            # Build the 9 shifted taps as static lane rotates in vregs (XLU),
            # concatenate along the channel axis, one bf16 MXU matmul.
            taps = []
            for off in offsets:
                if off == 0:
                    taps.append(fin)
                else:
                    taps.append(pltpu.roll(fin, shift=(-off) % Lflat, axis=1))
            packed = jnp.concatenate(taps, axis=0).astype(jnp.bfloat16)
            y = jnp.dot(w, packed,
                        preferred_element_type=jnp.float32)    # (co, Lflat)
            co = y.shape[0]
            # GroupNorm(num_groups=1): fused single-pass stats (sum and
            # sum-of-squares of the interior in ONE cross-lane reduction).
            ym = y * mask
            stacked = jnp.concatenate([ym, ym * ym], axis=0)   # (2*co, Lflat)
            rows = jnp.sum(stacked, axis=1, keepdims=True)     # (2*co, 1)
            mean = jnp.sum(rows[:co]) * inv_n
            var = jnp.sum(rows[co:]) * inv_n - mean * mean
            yn = (y - mean) * lax.rsqrt(var + _GN_EPS)
            return (yn * gamma + beta) * mask                  # keep zero ring/tail

        xf = x_ref[0].astype(jnp.float32)                      # (Cin, Lflat), pooled+padded

        # ---- DoubleConv(Cin, Cin, residual=True) ----
        h1 = _gelu(conv_gn(xf, w1_ref[...], g1_ref[...], b1_ref[...], inv_n1))
        d1 = _gelu(xf + conv_gn(h1, w2_ref[...], g2_ref[...], b2_ref[...], inv_n1))

        # ---- DoubleConv(Cin, Cout) ----
        h2 = _gelu(conv_gn(d1, w3_ref[...], g3_ref[...], b3_ref[...], inv_n2))
        y4 = conv_gn(h2, w4_ref[...], g4_ref[...], b4_ref[...], inv_n2)

        # ---- + per-channel time embedding (precomputed in the wrapper) ----
        out_ref[0] = (y4 + emb_ref[0]).astype(out_ref.dtype)   # lane-dense store

    return kernel


# ---------------------------------------------------------------------------
# Wrapper: pools + pads input, packs weights, precomputes emb, crops output.
# ---------------------------------------------------------------------------
def _pack_conv_weight(w):
    # torch Conv2d weight (Cout, Cin, 3, 3) -> (Cout, 9*Cin), tap-major (dy,dx,ci),
    # cast to bf16 for the native MXU path (accumulation stays f32).
    co, ci = w.shape[0], w.shape[1]
    return jnp.transpose(w, (0, 2, 3, 1)).reshape(co, 9 * ci).astype(jnp.bfloat16)


def _col(v):
    return jnp.reshape(v, (-1, 1)).astype(jnp.float32)


def down_forward(params, x_nchw, t):
    """Down(x, t): x (N, Cin, H2, W2) NCHW, t (N, E) -> (N, Cout, H2//2, W2//2)."""
    N, Cin, H2, W2 = x_nchw.shape
    H, W = H2 // 2, W2 // 2
    Hp, Wp = H + 2, W + 2
    Lflat = ((Hp * Wp + 127) // 128) * 128
    Cout = params["dc2_w1"].shape[0]

    # ---- XLA layout glue (per perf review): 2x2 maxpool + zero-ring pad,
    #      flattened into the lane-dense padded-flat layout the kernel uses.
    xf = x_nchw.astype(jnp.float32)
    pooled = jnp.max(xf.reshape(N, Cin, H, 2, W, 2), axis=(3, 5))       # (N,Cin,H,W)
    xpad = jnp.pad(pooled, ((0, 0), (0, 0), (1, 1), (1, 1)))            # (N,Cin,Hp,Wp)
    xflat = jnp.pad(xpad.reshape(N, Cin, Hp * Wp),
                    ((0, 0), (0, 0), (0, Lflat - Hp * Wp)))             # (N,Cin,Lflat)

    # interior mask of the padded-flat domain (compile-time constant)
    m2 = np.zeros((Hp, Wp), np.float32)
    m2[1:H + 1, 1:W + 1] = 1.0
    mask_np = np.zeros((1, Lflat), np.float32)
    mask_np[0, :Hp * Wp] = m2.reshape(-1)
    mask = jnp.asarray(mask_np)

    # conv weights / GN affine params
    w1 = _pack_conv_weight(params["dc1_w1"])
    w2 = _pack_conv_weight(params["dc1_w2"])
    w3 = _pack_conv_weight(params["dc2_w1"])
    w4 = _pack_conv_weight(params["dc2_w2"])
    g1, b1 = _col(params["dc1_g1"]), _col(params["dc1_b1"])
    g2, b2 = _col(params["dc1_g2"]), _col(params["dc1_b2"])
    g3, b3 = _col(params["dc2_g1"]), _col(params["dc2_b1"])
    g4, b4 = _col(params["dc2_g2"]), _col(params["dc2_b2"])

    # ---- time embedding: SiLU -> Linear for all N in one tiny XLA matmul
    emb = (jax.nn.silu(t.astype(jnp.float32)) @ params["lin_w"].astype(jnp.float32).T
           + params["lin_b"].astype(jnp.float32))                       # (N, Cout)
    emb3 = emb[:, :, None]                                              # (N, Cout, 1)

    def const_spec(shape):
        return pl.BlockSpec(shape, lambda n: (0,) * len(shape))

    in_specs = [
        pl.BlockSpec((1, Cin, Lflat), lambda n: (n, 0, 0)),   # pooled+padded input
        const_spec((1, Lflat)),                               # interior mask
        const_spec(w1.shape), const_spec(g1.shape), const_spec(b1.shape),
        const_spec(w2.shape), const_spec(g2.shape), const_spec(b2.shape),
        const_spec(w3.shape), const_spec(g3.shape), const_spec(b3.shape),
        const_spec(w4.shape), const_spec(g4.shape), const_spec(b4.shape),
        pl.BlockSpec((1, Cout, 1), lambda n: (n, 0, 0)),      # per-sample emb column
    ]

    out_flat = pl.pallas_call(
        _make_down_kernel(H, W, Cin, Cout, Lflat),
        out_shape=jax.ShapeDtypeStruct((N, Cout, Lflat), jnp.float32),
        grid=(N,),
        in_specs=in_specs,
        out_specs=pl.BlockSpec((1, Cout, Lflat), lambda n: (n, 0, 0)),
        compiler_params=pltpu.CompilerParams(
            dimension_semantics=("parallel",),
            vmem_limit_bytes=32 * 1024 * 1024),
    )(xflat, mask, w1, g1, b1, w2, g2, b2, w3, g3, b3, w4, g4, b4, emb3)

    # crop the interior of the padded-flat output -> NCHW directly
    out = out_flat[:, :, :Hp * Wp].reshape(N, Cout, Hp, Wp)[:, :, 1:H + 1, 1:W + 1]
    return out


# ---------------------------------------------------------------------------
# Pure-JAX reference (for correctness check only)
# ---------------------------------------------------------------------------
def _ref_conv_gn(x_nhwc, w_torch, g, b):
    w_hwio = jnp.transpose(w_torch, (2, 3, 1, 0))
    y = lax.conv_general_dilated(x_nhwc, w_hwio, (1, 1), "SAME",
                                 dimension_numbers=("NHWC", "HWIO", "NHWC"))
    mu = jnp.mean(y, axis=(1, 2, 3), keepdims=True)
    var = jnp.mean((y - mu) ** 2, axis=(1, 2, 3), keepdims=True)
    return (y - mu) * lax.rsqrt(var + _GN_EPS) * g + b


def _ref_double_conv(x, w1, g1, b1, w2, g2, b2, residual):
    h = jax.nn.gelu(_ref_conv_gn(x, w1, g1, b1), approximate=False)
    y = _ref_conv_gn(h, w2, g2, b2)
    return jax.nn.gelu(x + y, approximate=False) if residual else y


def ref_down(params, x_nchw, t):
    x = jnp.transpose(x_nchw, (0, 2, 3, 1))
    xp = lax.reduce_window(x, -jnp.inf, lax.max, (1, 2, 2, 1), (1, 2, 2, 1), "VALID")
    d1 = _ref_double_conv(xp, params["dc1_w1"], params["dc1_g1"], params["dc1_b1"],
                          params["dc1_w2"], params["dc1_g2"], params["dc1_b2"], True)
    d2 = _ref_double_conv(d1, params["dc2_w1"], params["dc2_g1"], params["dc2_b1"],
                          params["dc2_w2"], params["dc2_g2"], params["dc2_b2"], False)
    emb = jax.nn.silu(t) @ params["lin_w"].T + params["lin_b"]
    out = d2 + emb[:, None, None, :]
    return jnp.transpose(out, (0, 3, 1, 2))


# ---------------------------------------------------------------------------
if __name__ == "__main__":
    N, C_IN, C_OUT, H, W, EMB = 2, 4, 8, 16, 16, 32

    key = jax.random.PRNGKey(0)
    ks = jax.random.split(key, 16)

    params = {
        # DoubleConv(C_IN, C_IN, residual=True)  (torch Conv2d weight layout)
        "dc1_w1": 0.1 * jax.random.normal(ks[0], (C_IN, C_IN, 3, 3), jnp.float32),
        "dc1_g1": 1.0 + 0.1 * jax.random.normal(ks[1], (C_IN,), jnp.float32),
        "dc1_b1": 0.1 * jax.random.normal(ks[2], (C_IN,), jnp.float32),
        "dc1_w2": 0.1 * jax.random.normal(ks[3], (C_IN, C_IN, 3, 3), jnp.float32),
        "dc1_g2": 1.0 + 0.1 * jax.random.normal(ks[4], (C_IN,), jnp.float32),
        "dc1_b2": 0.1 * jax.random.normal(ks[5], (C_IN,), jnp.float32),
        # DoubleConv(C_IN, C_OUT)
        "dc2_w1": 0.1 * jax.random.normal(ks[6], (C_OUT, C_IN, 3, 3), jnp.float32),
        "dc2_g1": 1.0 + 0.1 * jax.random.normal(ks[7], (C_OUT,), jnp.float32),
        "dc2_b1": 0.1 * jax.random.normal(ks[8], (C_OUT,), jnp.float32),
        "dc2_w2": 0.1 * jax.random.normal(ks[9], (C_OUT, C_OUT, 3, 3), jnp.float32),
        "dc2_g2": 1.0 + 0.1 * jax.random.normal(ks[10], (C_OUT,), jnp.float32),
        "dc2_b2": 0.1 * jax.random.normal(ks[11], (C_OUT,), jnp.float32),
        # emb_layer: SiLU -> Linear(EMB, C_OUT), torch layout (out, in)
        "lin_w": 0.1 * jax.random.normal(ks[12], (C_OUT, EMB), jnp.float32),
        "lin_b": 0.1 * jax.random.normal(ks[13], (C_OUT,), jnp.float32),
    }

    x = jax.random.normal(ks[14], (N, C_IN, H, W), jnp.float32)   # NCHW like PyTorch
    t = jax.random.normal(ks[15], (N, EMB), jnp.float32)

    out = jax.block_until_ready(jax.jit(down_forward)(params, x, t))

    expected = jax.block_until_ready(ref_down(params, x, t))
    assert out.shape == (N, C_OUT, H // 2, W // 2), out.shape
    # Tolerance accounts for bf16 MXU conv inputs (f32 accumulation) and the
    # approx-EUP reciprocal in the GELU erf polynomial vs. the f32 reference.
    np.testing.assert_allclose(np.asarray(out), np.asarray(expected),
                               rtol=2e-2, atol=2e-2)
    print("KERNEL_OK")
</pallas_src>

<mosaic_0001>
module attributes {stable_mosaic.version = 11 : i64} {
  func.func @kernel(%arg0: i32, %arg1: memref<1x4x128xf32, #tpu.memory_space<vmem>>, %arg2: memref<1x128xf32, #tpu.memory_space<vmem>>, %arg3: memref<4x36xbf16, #tpu.memory_space<vmem>>, %arg4: memref<4x1xf32, #tpu.memory_space<vmem>>, %arg5: memref<4x1xf32, #tpu.memory_space<vmem>>, %arg6: memref<4x36xbf16, #tpu.memory_space<vmem>>, %arg7: memref<4x1xf32, #tpu.memory_space<vmem>>, %arg8: memref<4x1xf32, #tpu.memory_space<vmem>>, %arg9: memref<8x36xbf16, #tpu.memory_space<vmem>>, %arg10: memref<8x1xf32, #tpu.memory_space<vmem>>, %arg11: memref<8x1xf32, #tpu.memory_space<vmem>>, %arg12: memref<8x72xbf16, #tpu.memory_space<vmem>>, %arg13: memref<8x1xf32, #tpu.memory_space<vmem>>, %arg14: memref<8x1xf32, #tpu.memory_space<vmem>>, %arg15: memref<1x8x1xf32, #tpu.memory_space<vmem>>, %arg16: memref<1x8x128xf32, #tpu.memory_space<vmem>>) attributes {dimension_semantics = [#tpu.dimension_semantics<parallel>], iteration_bounds = array<i64: 2>, scalar_prefetch = 0 : i64, scratch_operands = 0 : i64, tpu.core_type = #tpu.core_type<tc>, window_params = [{transform_indices = @transform_0, window_bounds = array<i64: 1, 4, 128>}, {pipeline_mode = #tpu.pipeline_mode<synchronous>, transform_indices = @transform_1, window_bounds = array<i64: 1, 128>}, {pipeline_mode = #tpu.pipeline_mode<synchronous>, transform_indices = @transform_2, window_bounds = array<i64: 4, 36>}, {pipeline_mode = #tpu.pipeline_mode<synchronous>, transform_indices = @transform_3, window_bounds = array<i64: 4, 1>}, {pipeline_mode = #tpu.pipeline_mode<synchronous>, transform_indices = @transform_4, window_bounds = array<i64: 4, 1>}, {pipeline_mode = #tpu.pipeline_mode<synchronous>, transform_indices = @transform_5, window_bounds = array<i64: 4, 36>}, {pipeline_mode = #tpu.pipeline_mode<synchronous>, transform_indices = @transform_6, window_bounds = array<i64: 4, 1>}, {pipeline_mode = #tpu.pipeline_mode<synchronous>, transform_indices = @transform_7, window_bounds = array<i64: 4, 1>}, {pipeline_mode = #tpu.pipeline_mode<synchronous>, transform_indices = @transform_8, window_bounds = array<i64: 8, 36>}, {pipeline_mode = #tpu.pipeline_mode<synchronous>, transform_indices = @transform_9, window_bounds = array<i64: 8, 1>}, {pipeline_mode = #tpu.pipeline_mode<synchronous>, transform_indices = @transform_10, window_bounds = array<i64: 8, 1>}, {pipeline_mode = #tpu.pipeline_mode<synchronous>, transform_indices = @transform_11, window_bounds = array<i64: 8, 72>}, {pipeline_mode = #tpu.pipeline_mode<synchronous>, transform_indices = @transform_12, window_bounds = array<i64: 8, 1>}, {pipeline_mode = #tpu.pipeline_mode<synchronous>, transform_indices = @transform_13, window_bounds = array<i64: 8, 1>}, {transform_indices = @transform_14, window_bounds = array<i64: 1, 8, 1>}, {transform_indices = @transform_15, window_bounds = array<i64: 1, 8, 128>}]} {
    %c0 = arith.constant 0 : index
    %c0_0 = arith.constant 0 : index
    %0 = vector.load %arg2[%c0, %c0_0] : memref<1x128xf32, #tpu.memory_space<vmem>>, vector<1x128xf32>
    %c0_1 = arith.constant 0 : index
    %c0_2 = arith.constant 0 : index
    %c0_3 = arith.constant 0 : index
    %1 = vector.load %arg1[%c0_1, %c0_2, %c0_3] : memref<1x4x128xf32, #tpu.memory_space<vmem>>, vector<1x4x128xf32>
    %2 = vector.shape_cast %1 : vector<1x4x128xf32> to vector<4x128xf32>
    %c0_4 = arith.constant 0 : index
    %c0_5 = arith.constant 0 : index
    %3 = vector.load %arg3[%c0_4, %c0_5] : memref<4x36xbf16, #tpu.memory_space<vmem>>, vector<4x36xbf16>
    %c0_6 = arith.constant 0 : index
    %c0_7 = arith.constant 0 : index
    %4 = vector.load %arg4[%c0_6, %c0_7] : memref<4x1xf32, #tpu.memory_space<vmem>>, vector<4x1xf32>
    %c0_8 = arith.constant 0 : index
    %c0_9 = arith.constant 0 : index
    %5 = vector.load %arg5[%c0_8, %c0_9] : memref<4x1xf32, #tpu.memory_space<vmem>>, vector<4x1xf32>
    %c11_i32 = arith.constant 11 : i32
    %6 = tpu.dynamic_rotate %2 by %c11_i32 dim 1 : vector<4x128xf32>, i32 -> vector<4x128xf32>
    %c10_i32 = arith.constant 10 : i32
    %7 = tpu.dynamic_rotate %2 by %c10_i32 dim 1 : vector<4x128xf32>, i32 -> vector<4x128xf32>
    %c9_i32 = arith.constant 9 : i32
    %8 = tpu.dynamic_rotate %2 by %c9_i32 dim 1 : vector<4x128xf32>, i32 -> vector<4x128xf32>
    %c1_i32 = arith.constant 1 : i32
    %9 = tpu.dynamic_rotate %2 by %c1_i32 dim 1 : vector<4x128xf32>, i32 -> vector<4x128xf32>
    %c127_i32 = arith.constant 127 : i32
    %10 = tpu.dynamic_rotate %2 by %c127_i32 dim 1 : vector<4x128xf32>, i32 -> vector<4x128xf32>
    %c119_i32 = arith.constant 119 : i32
    %11 = tpu.dynamic_rotate %2 by %c119_i32 dim 1 : vector<4x128xf32>, i32 -> vector<4x128xf32>
    %c118_i32 = arith.constant 118 : i32
    %12 = tpu.dynamic_rotate %2 by %c118_i32 dim 1 : vector<4x128xf32>, i32 -> vector<4x128xf32>
    %c117_i32 = arith.constant 117 : i32
    %13 = tpu.dynamic_rotate %2 by %c117_i32 dim 1 : vector<4x128xf32>, i32 -> vector<4x128xf32>
    %14 = tpu.concatenate %6, %7, %8, %9, %2, %10, %11, %12, %13 in 0 : vector<4x128xf32>, vector<4x128xf32>, vector<4x128xf32>, vector<4x128xf32>, vector<4x128xf32>, vector<4x128xf32>, vector<4x128xf32>, vector<4x128xf32>, vector<4x128xf32> -> vector<36x128xf32>
    %15 = arith.truncf %14 : vector<36x128xf32> to vector<36x128xbf16>
    %cst = arith.constant dense<0.000000e+00> : vector<4x128xf32>
    %16 = tpu.matmul %3, %15, %cst {dimension_numbers = #tpu.dot_dimension_numbers<[1], [0], [0], [1], [0, 0, 1, 1], [], []>} : vector<4x36xbf16>, vector<36x128xbf16>, vector<4x128xf32> -> vector<4x128xf32>
    %17 = vector.broadcast %0 : vector<1x128xf32> to vector<4x128xf32>
    %18 = arith.mulf %16, %17 : vector<4x128xf32>
    %19 = arith.mulf %18, %18 : vector<4x128xf32>
    %20 = tpu.concatenate %18, %19 in 0 : vector<4x128xf32>, vector<4x128xf32> -> vector<8x128xf32>
    %cst_10 = arith.constant dense<0.000000e+00> : vector<8xf32>
    %21 = vector.multi_reduction <add>, %20, %cst_10 [1] : vector<8x128xf32> to vector<8xf32>
    %22 = vector.shape_cast %21 : vector<8xf32> to vector<8x1xf32>
    %23 = vector.extract_strided_slice %22 {offsets = [0, 0], sizes = [4, 1], strides = [1, 1]} : vector<8x1xf32> to vector<4x1xf32>
    %24 = vector.shape_cast %23 : vector<4x1xf32> to vector<1x4x1xf32>
    %cst_11 = arith.constant dense<0.000000e+00> : vector<1xf32>
    %25 = vector.multi_reduction <add>, %24, %cst_11 [1, 2] : vector<1x4x1xf32> to vector<1xf32>
    %26 = vector.shape_cast %25 : vector<1xf32> to vector<1x1x1xf32>
    %27 = vector.extract %26[0, 0, 0] : f32 from vector<1x1x1xf32>
    %cst_12 = arith.constant 3.906250e-03 : f32
    %28 = arith.mulf %27, %cst_12 : f32
    %29 = vector.extract_strided_slice %22 {offsets = [4, 0], sizes = [4, 1], strides = [1, 1]} : vector<8x1xf32> to vector<4x1xf32>
    %30 = vector.shape_cast %29 : vector<4x1xf32> to vector<1x4x1xf32>
    %cst_13 = arith.constant dense<0.000000e+00> : vector<1xf32>
    %31 = vector.multi_reduction <add>, %30, %cst_13 [1, 2] : vector<1x4x1xf32> to vector<1xf32>
    %32 = vector.shape_cast %31 : vector<1xf32> to vector<1x1x1xf32>
    %33 = vector.extract %32[0, 0, 0] : f32 from vector<1x1x1xf32>
    %cst_14 = arith.constant 3.906250e-03 : f32
    %34 = arith.mulf %33, %cst_14 : f32
    %35 = arith.mulf %28, %28 : f32
    %36 = arith.subf %34, %35 : f32
    %37 = vector.broadcast %28 : f32 to vector<4x128xf32>
    %38 = arith.subf %16, %37 : vector<4x128xf32>
    %cst_15 = arith.constant 9.99999974E-6 : f32
    %39 = arith.addf %36, %cst_15 : f32
    %40 = math.rsqrt %39 : f32
    %41 = vector.broadcast %40 : f32 to vector<4x128xf32>
    %42 = arith.mulf %38, %41 : vector<4x128xf32>
    %43 = vector.broadcast %4 : vector<4x1xf32> to vector<4x128xf32>
    %44 = arith.mulf %42, %43 : vector<4x128xf32>
    %45 = vector.broadcast %5 : vector<4x1xf32> to vector<4x128xf32>
    %46 = arith.addf %44, %45 : vector<4x128xf32>
    %47 = vector.broadcast %0 : vector<1x128xf32> to vector<4x128xf32>
    %48 = arith.mulf %46, %47 : vector<4x128xf32>
    %cst_16 = arith.constant 5.000000e-01 : f32
    %49 = vector.broadcast %cst_16 : f32 to vector<4x128xf32>
    %50 = arith.mulf %49, %48 : vector<4x128xf32>
    %cst_17 = arith.constant 0.707106769 : f32
    %51 = vector.broadcast %cst_17 : f32 to vector<4x128xf32>
    %52 = arith.mulf %48, %51 : vector<4x128xf32>
    %53 = math.absf %52 : vector<4x128xf32>
    %cst_18 = arith.constant 0.327591091 : f32
    %54 = vector.broadcast %cst_18 : f32 to vector<4x128xf32>
    %55 = arith.mulf %54, %53 : vector<4x128xf32>
    %cst_19 = arith.constant 1.000000e+00 : f32
    %56 = vector.broadcast %cst_19 : f32 to vector<4x128xf32>
    %57 = arith.addf %56, %55 : vector<4x128xf32>
    %58 = tpu.reciprocal %57 {approx = true} : vector<4x128xf32> -> vector<4x128xf32>
    %cst_20 = arith.constant 1.06140542 : f32
    %59 = vector.broadcast %cst_20 : f32 to vector<4x128xf32>
    %60 = arith.mulf %59, %58 : vector<4x128xf32>
    %cst_21 = arith.constant -1.45315206 : f32
    %61 = vector.broadcast %cst_21 : f32 to vector<4x128xf32>
    %62 = arith.addf %60, %61 : vector<4x128xf32>
    %63 = arith.mulf %62, %58 : vector<4x128xf32>
    %cst_22 = arith.constant 1.42141378 : f32
    %64 = vector.broadcast %cst_22 : f32 to vector<4x128xf32>
    %65 = arith.addf %63, %64 : vector<4x128xf32>
    %66 = arith.mulf %65, %58 : vector<4x128xf32>
    %cst_23 = arith.constant -0.284496725 : f32
    %67 = vector.broadcast %cst_23 : f32 to vector<4x128xf32>
    %68 = arith.addf %66, %67 : vector<4x128xf32>
    %69 = arith.mulf %68, %58 : vector<4x128xf32>
    %cst_24 = arith.constant 0.254829586 : f32
    %70 = vector.broadcast %cst_24 : f32 to vector<4x128xf32>
    %71 = arith.addf %69, %70 : vector<4x128xf32>
    %72 = arith.mulf %71, %58 : vector<4x128xf32>
    %cst_25 = arith.constant 0.000000e+00 : f32
    %73 = vector.broadcast %cst_25 : f32 to vector<4x128xf32>
    %74 = arith.subf %73, %53 : vector<4x128xf32>
    %75 = arith.mulf %74, %53 : vector<4x128xf32>
    %76 = math.exp %75 : vector<4x128xf32>
    %77 = arith.mulf %72, %76 : vector<4x128xf32>
    %cst_26 = arith.constant 1.000000e+00 : f32
    %78 = vector.broadcast %cst_26 : f32 to vector<4x128xf32>
    %79 = arith.subf %78, %77 : vector<4x128xf32>
    %cst_27 = arith.constant 0.000000e+00 : f32
    %80 = vector.broadcast %cst_27 : f32 to vector<4x128xf32>
    %81 = arith.cmpf oge, %52, %80 : vector<4x128xf32>
    %cst_28 = arith.constant 0.000000e+00 : f32
    %82 = vector.broadcast %cst_28 : f32 to vector<4x128xf32>
    %83 = arith.subf %82, %79 : vector<4x128xf32>
    %84 = arith.select %81, %79, %83 : vector<4x128xi1>, vector<4x128xf32>
    %cst_29 = arith.constant 1.000000e+00 : f32
    %85 = vector.broadcast %cst_29 : f32 to vector<4x128xf32>
    %86 = arith.addf %85, %84 : vector<4x128xf32>
    %87 = arith.mulf %50, %86 : vector<4x128xf32>
    %c0_30 = arith.constant 0 : index
    %c0_31 = arith.constant 0 : index
    %88 = vector.load %arg6[%c0_30, %c0_31] : memref<4x36xbf16, #tpu.memory_space<vmem>>, vector<4x36xbf16>
    %c0_32 = arith.constant 0 : index
    %c0_33 = arith.constant 0 : index
    %89 = vector.load %arg7[%c0_32, %c0_33] : memref<4x1xf32, #tpu.memory_space<vmem>>, vector<4x1xf32>
    %c0_34 = arith.constant 0 : index
    %c0_35 = arith.constant 0 : index
    %90 = vector.load %arg8[%c0_34, %c0_35] : memref<4x1xf32, #tpu.memory_space<vmem>>, vector<4x1xf32>
    %c11_i32_36 = arith.constant 11 : i32
    %91 = tpu.dynamic_rotate %87 by %c11_i32_36 dim 1 : vector<4x128xf32>, i32 -> vector<4x128xf32>
    %c10_i32_37 = arith.constant 10 : i32
    %92 = tpu.dynamic_rotate %87 by %c10_i32_37 dim 1 : vector<4x128xf32>, i32 -> vector<4x128xf32>
    %c9_i32_38 = arith.constant 9 : i32
    %93 = tpu.dynamic_rotate %87 by %c9_i32_38 dim 1 : vector<4x128xf32>, i32 -> vector<4x128xf32>
    %c1_i32_39 = arith.constant 1 : i32
    %94 = tpu.dynamic_rotate %87 by %c1_i32_39 dim 1 : vector<4x128xf32>, i32 -> vector<4x128xf32>
    %c127_i32_40 = arith.constant 127 : i32
    %95 = tpu.dynamic_rotate %87 by %c127_i32_40 dim 1 : vector<4x128xf32>, i32 -> vector<4x128xf32>
    %c119_i32_41 = arith.constant 119 : i32
    %96 = tpu.dynamic_rotate %87 by %c119_i32_41 dim 1 : vector<4x128xf32>, i32 -> vector<4x128xf32>
    %c118_i32_42 = arith.constant 118 : i32
    %97 = tpu.dynamic_rotate %87 by %c118_i32_42 dim 1 : vector<4x128xf32>, i32 -> vector<4x128xf32>
    %c117_i32_43 = arith.constant 117 : i32
    %98 = tpu.dynamic_rotate %87 by %c117_i32_43 dim 1 : vector<4x128xf32>, i32 -> vector<4x128xf32>
    %99 = tpu.concatenate %91, %92, %93, %94, %87, %95, %96, %97, %98 in 0 : vector<4x128xf32>, vector<4x128xf32>, vector<4x128xf32>, vector<4x128xf32>, vector<4x128xf32>, vector<4x128xf32>, vector<4x128xf32>, vector<4x128xf32>, vector<4x128xf32> -> vector<36x128xf32>
    %100 = arith.truncf %99 : vector<36x128xf32> to vector<36x128xbf16>
    %cst_44 = arith.constant dense<0.000000e+00> : vector<4x128xf32>
    %101 = tpu.matmul %88, %100, %cst_44 {dimension_numbers = #tpu.dot_dimension_numbers<[1], [0], [0], [1], [0, 0, 1, 1], [], []>} : vector<4x36xbf16>, vector<36x128xbf16>, vector<4x128xf32> -> vector<4x128xf32>
    %102 = vector.broadcast %0 : vector<1x128xf32> to vector<4x128xf32>
    %103 = arith.mulf %101, %102 : vector<4x128xf32>
    %104 = arith.mulf %103, %103 : vector<4x128xf32>
    %105 = tpu.concatenate %103, %104 in 0 : vector<4x128xf32>, vector<4x128xf32> -> vector<8x128xf32>
    %cst_45 = arith.constant dense<0.000000e+00> : vector<8xf32>
    %106 = vector.multi_reduction <add>, %105, %cst_45 [1] : vector<8x128xf32> to vector<8xf32>
    %107 = vector.shape_cast %106 : vector<8xf32> to vector<8x1xf32>
    %108 = vector.extract_strided_slice %107 {offsets = [0, 0], sizes = [4, 1], strides = [1, 1]} : vector<8x1xf32> to vector<4x1xf32>
    %109 = vector.shape_cast %108 : vector<4x1xf32> to vector<1x4x1xf32>
    %cst_46 = arith.constant dense<0.000000e+00> : vector<1xf32>
    %110 = vector.multi_reduction <add>, %109, %cst_46 [1, 2] : vector<1x4x1xf32> to vector<1xf32>
    %111 = vector.shape_cast %110 : vector<1xf32> to vector<1x1x1xf32>
    %112 = vector.extract %111[0, 0, 0] : f32 from vector<1x1x1xf32>
    %cst_47 = arith.constant 3.906250e-03 : f32
    %113 = arith.mulf %112, %cst_47 : f32
    %114 = vector.extract_strided_slice %107 {offsets = [4, 0], sizes = [4, 1], strides = [1, 1]} : vector<8x1xf32> to vector<4x1xf32>
    %115 = vector.shape_cast %114 : vector<4x1xf32> to vector<1x4x1xf32>
    %cst_48 = arith.constant dense<0.000000e+00> : vector<1xf32>
    %116 = vector.multi_reduction <add>, %115, %cst_48 [1, 2] : vector<1x4x1xf32> to vector<1xf32>
    %117 = vector.shape_cast %116 : vector<1xf32> to vector<1x1x1xf32>
    %118 = vector.extract %117[0, 0, 0] : f32 from vector<1x1x1xf32>
    %cst_49 = arith.constant 3.906250e-03 : f32
    %119 = arith.mulf %118, %cst_49 : f32
    %120 = arith.mulf %113, %113 : f32
    %121 = arith.subf %119, %120 : f32
    %122 = vector.broadcast %113 : f32 to vector<4x128xf32>
    %123 = arith.subf %101, %122 : vector<4x128xf32>
    %cst_50 = arith.constant 9.99999974E-6 : f32
    %124 = arith.addf %121, %cst_50 : f32
    %125 = math.rsqrt %124 : f32
    %126 = vector.broadcast %125 : f32 to vector<4x128xf32>
    %127 = arith.mulf %123, %126 : vector<4x128xf32>
    %128 = vector.broadcast %89 : vector<4x1xf32> to vector<4x128xf32>
    %129 = arith.mulf %127, %128 : vector<4x128xf32>
    %130 = vector.broadcast %90 : vector<4x1xf32> to vector<4x128xf32>
    %131 = arith.addf %129, %130 : vector<4x128xf32>
    %132 = vector.broadcast %0 : vector<1x128xf32> to vector<4x128xf32>
    %133 = arith.mulf %131, %132 : vector<4x128xf32>
    %134 = arith.addf %2, %133 : vector<4x128xf32>
    %cst_51 = arith.constant 5.000000e-01 : f32
    %135 = vector.broadcast %cst_51 : f32 to vector<4x128xf32>
    %136 = arith.mulf %135, %134 : vector<4x128xf32>
    %cst_52 = arith.constant 0.707106769 : f32
    %137 = vector.broadcast %cst_52 : f32 to vector<4x128xf32>
    %138 = arith.mulf %134, %137 : vector<4x128xf32>
    %139 = math.absf %138 : vector<4x128xf32>
    %cst_53 = arith.constant 0.327591091 : f32
    %140 = vector.broadcast %cst_53 : f32 to vector<4x128xf32>
    %141 = arith.mulf %140, %139 : vector<4x128xf32>
    %cst_54 = arith.constant 1.000000e+00 : f32
    %142 = vector.broadcast %cst_54 : f32 to vector<4x128xf32>
    %143 = arith.addf %142, %141 : vector<4x128xf32>
    %144 = tpu.reciprocal %143 {approx = true} : vector<4x128xf32> -> vector<4x128xf32>
    %cst_55 = arith.constant 1.06140542 : f32
    %145 = vector.broadcast %cst_55 : f32 to vector<4x128xf32>
    %146 = arith.mulf %145, %144 : vector<4x128xf32>
    %cst_56 = arith.constant -1.45315206 : f32
    %147 = vector.broadcast %cst_56 : f32 to vector<4x128xf32>
    %148 = arith.addf %146, %147 : vector<4x128xf32>
    %149 = arith.mulf %148, %144 : vector<4x128xf32>
    %cst_57 = arith.constant 1.42141378 : f32
    %150 = vector.broadcast %cst_57 : f32 to vector<4x128xf32>
    %151 = arith.addf %149, %150 : vector<4x128xf32>
    %152 = arith.mulf %151, %144 : vector<4x128xf32>
    %cst_58 = arith.constant -0.284496725 : f32
    %153 = vector.broadcast %cst_58 : f32 to vector<4x128xf32>
    %154 = arith.addf %152, %153 : vector<4x128xf32>
    %155 = arith.mulf %154, %144 : vector<4x128xf32>
    %cst_59 = arith.constant 0.254829586 : f32
    %156 = vector.broadcast %cst_59 : f32 to vector<4x128xf32>
    %157 = arith.addf %155, %156 : vector<4x128xf32>
    %158 = arith.mulf %157, %144 : vector<4x128xf32>
    %cst_60 = arith.constant 0.000000e+00 : f32
    %159 = vector.broadcast %cst_60 : f32 to vector<4x128xf32>
    %160 = arith.subf %159, %139 : vector<4x128xf32>
    %161 = arith.mulf %160, %139 : vector<4x128xf32>
    %162 = math.exp %161 : vector<4x128xf32>
    %163 = arith.mulf %158, %162 : vector<4x128xf32>
    %cst_61 = arith.constant 1.000000e+00 : f32
    %164 = vector.broadcast %cst_61 : f32 to vector<4x128xf32>
    %165 = arith.subf %164, %163 : vector<4x128xf32>
    %cst_62 = arith.constant 0.000000e+00 : f32
    %166 = vector.broadcast %cst_62 : f32 to vector<4x128xf32>
    %167 = arith.cmpf oge, %138, %166 : vector<4x128xf32>
    %cst_63 = arith.constant 0.000000e+00 : f32
    %168 = vector.broadcast %cst_63 : f32 to vector<4x128xf32>
    %169 = arith.subf %168, %165 : vector<4x128xf32>
    %170 = arith.select %167, %165, %169 : vector<4x128xi1>, vector<4x128xf32>
    %cst_64 = arith.constant 1.000000e+00 : f32
    %171 = vector.broadcast %cst_64 : f32 to vector<4x128xf32>
    %172 = arith.addf %171, %170 : vector<4x128xf32>
    %173 = arith.mulf %136, %172 : vector<4x128xf32>
    %c0_65 = arith.constant 0 : index
    %c0_66 = arith.constant 0 : index
    %174 = vector.load %arg9[%c0_65, %c0_66] : memref<8x36xbf16, #tpu.memory_space<vmem>>, vector<8x36xbf16>
    %c0_67 = arith.constant 0 : index
    %c0_68 = arith.constant 0 : index
    %175 = vector.load %arg10[%c0_67, %c0_68] : memref<8x1xf32, #tpu.memory_space<vmem>>, vector<8x1xf32>
    %c0_69 = arith.constant 0 : index
    %c0_70 = arith.constant 0 : index
    %176 = vector.load %arg11[%c0_69, %c0_70] : memref<8x1xf32, #tpu.memory_space<vmem>>, vector<8x1xf32>
    %c11_i32_71 = arith.constant 11 : i32
    %177 = tpu.dynamic_rotate %173 by %c11_i32_71 dim 1 : vector<4x128xf32>, i32 -> vector<4x128xf32>
    %c10_i32_72 = arith.constant 10 : i32
    %178 = tpu.dynamic_rotate %173 by %c10_i32_72 dim 1 : vector<4x128xf32>, i32 -> vector<4x128xf32>
    %c9_i32_73 = arith.constant 9 : i32
    %179 = tpu.dynamic_rotate %173 by %c9_i32_73 dim 1 : vector<4x128xf32>, i32 -> vector<4x128xf32>
    %c1_i32_74 = arith.constant 1 : i32
    %180 = tpu.dynamic_rotate %173 by %c1_i32_74 dim 1 : vector<4x128xf32>, i32 -> vector<4x128xf32>
    %c127_i32_75 = arith.constant 127 : i32
    %181 = tpu.dynamic_rotate %173 by %c127_i32_75 dim 1 : vector<4x128xf32>, i32 -> vector<4x128xf32>
    %c119_i32_76 = arith.constant 119 : i32
    %182 = tpu.dynamic_rotate %173 by %c119_i32_76 dim 1 : vector<4x128xf32>, i32 -> vector<4x128xf32>
    %c118_i32_77 = arith.constant 118 : i32
    %183 = tpu.dynamic_rotate %173 by %c118_i32_77 dim 1 : vector<4x128xf32>, i32 -> vector<4x128xf32>
    %c117_i32_78 = arith.constant 117 : i32
    %184 = tpu.dynamic_rotate %173 by %c117_i32_78 dim 1 : vector<4x128xf32>, i32 -> vector<4x128xf32>
    %185 = tpu.concatenate %177, %178, %179, %180, %173, %181, %182, %183, %184 in 0 : vector<4x128xf32>, vector<4x128xf32>, vector<4x128xf32>, vector<4x128xf32>, vector<4x128xf32>, vector<4x128xf32>, vector<4x128xf32>, vector<4x128xf32>, vector<4x128xf32> -> vector<36x128xf32>
    %186 = arith.truncf %185 : vector<36x128xf32> to vector<36x128xbf16>
    %cst_79 = arith.constant dense<0.000000e+00> : vector<8x128xf32>
    %187 = tpu.matmul %174, %186, %cst_79 {dimension_numbers = #tpu.dot_dimension_numbers<[1], [0], [0], [1], [0, 0, 1, 1], [], []>} : vector<8x36xbf16>, vector<36x128xbf16>, vector<8x128xf32> -> vector<8x128xf32>
    %188 = vector.broadcast %0 : vector<1x128xf32> to vector<8x128xf32>
    %189 = arith.mulf %187, %188 : vector<8x128xf32>
    %190 = arith.mulf %189, %189 : vector<8x128xf32>
    %191 = tpu.concatenate %189, %190 in 0 : vector<8x128xf32>, vector<8x128xf32> -> vector<16x128xf32>
    %cst_80 = arith.constant dense<0.000000e+00> : vector<16xf32>
    %192 = vector.multi_reduction <add>, %191, %cst_80 [1] : vector<16x128xf32> to vector<16xf32>
    %193 = vector.shape_cast %192 : vector<16xf32> to vector<16x1xf32>
    %194 = vector.extract_strided_slice %193 {offsets = [0, 0], sizes = [8, 1], strides = [1, 1]} : vector<16x1xf32> to vector<8x1xf32>
    %195 = vector.shape_cast %194 : vector<8x1xf32> to vector<1x8x1xf32>
    %cst_81 = arith.constant dense<0.000000e+00> : vector<1xf32>
    %196 = vector.multi_reduction <add>, %195, %cst_81 [1, 2] : vector<1x8x1xf32> to vector<1xf32>
    %197 = vector.shape_cast %196 : vector<1xf32> to vector<1x1x1xf32>
    %198 = vector.extract %197[0, 0, 0] : f32 from vector<1x1x1xf32>
    %cst_82 = arith.constant 0.001953125 : f32
    %199 = arith.mulf %198, %cst_82 : f32
    %200 = vector.extract_strided_slice %193 {offsets = [8, 0], sizes = [8, 1], strides = [1, 1]} : vector<16x1xf32> to vector<8x1xf32>
    %201 = vector.shape_cast %200 : vector<8x1xf32> to vector<1x8x1xf32>
    %cst_83 = arith.constant dense<0.000000e+00> : vector<1xf32>
    %202 = vector.multi_reduction <add>, %201, %cst_83 [1, 2] : vector<1x8x1xf32> to vector<1xf32>
    %203 = vector.shape_cast %202 : vector<1xf32> to vector<1x1x1xf32>
    %204 = vector.extract %203[0, 0, 0] : f32 from vector<1x1x1xf32>
    %cst_84 = arith.constant 0.001953125 : f32
    %205 = arith.mulf %204, %cst_84 : f32
    %206 = arith.mulf %199, %199 : f32
    %207 = arith.subf %205, %206 : f32
    %208 = vector.broadcast %199 : f32 to vector<8x128xf32>
    %209 = arith.subf %187, %208 : vector<8x128xf32>
    %cst_85 = arith.constant 9.99999974E-6 : f32
    %210 = arith.addf %207, %cst_85 : f32
    %211 = math.rsqrt %210 : f32
    %212 = vector.broadcast %211 : f32 to vector<8x128xf32>
    %213 = arith.mulf %209, %212 : vector<8x128xf32>
    %214 = vector.broadcast %175 : vector<8x1xf32> to vector<8x128xf32>
    %215 = arith.mulf %213, %214 : vector<8x128xf32>
    %216 = vector.broadcast %176 : vector<8x1xf32> to vector<8x128xf32>
    %217 = arith.addf %215, %216 : vector<8x128xf32>
    %218 = vector.broadcast %0 : vector<1x128xf32> to vector<8x128xf32>
    %219 = arith.mulf %217, %218 : vector<8x128xf32>
    %cst_86 = arith.constant 5.000000e-01 : f32
    %220 = vector.broadcast %cst_86 : f32 to vector<8x128xf32>
    %221 = arith.mulf %220, %219 : vector<8x128xf32>
    %cst_87 = arith.constant 0.707106769 : f32
    %222 = vector.broadcast %cst_87 : f32 to vector<8x128xf32>
    %223 = arith.mulf %219, %222 : vector<8x128xf32>
    %224 = math.absf %223 : vector<8x128xf32>
    %cst_88 = arith.constant 0.327591091 : f32
    %225 = vector.broadcast %cst_88 : f32 to vector<8x128xf32>
    %226 = arith.mulf %225, %224 : vector<8x128xf32>
    %cst_89 = arith.constant 1.000000e+00 : f32
    %227 = vector.broadcast %cst_89 : f32 to vector<8x128xf32>
    %228 = arith.addf %227, %226 : vector<8x128xf32>
    %229 = tpu.reciprocal %228 {approx = true} : vector<8x128xf32> -> vector<8x128xf32>
    %cst_90 = arith.constant 1.06140542 : f32
    %230 = vector.broadcast %cst_90 : f32 to vector<8x128xf32>
    %231 = arith.mulf %230, %229 : vector<8x128xf32>
    %cst_91 = arith.constant -1.45315206 : f32
    %232 = vector.broadcast %cst_91 : f32 to vector<8x128xf32>
    %233 = arith.addf %231, %232 : vector<8x128xf32>
    %234 = arith.mulf %233, %229 : vector<8x128xf32>
    %cst_92 = arith.constant 1.42141378 : f32
    %235 = vector.broadcast %cst_92 : f32 to vector<8x128xf32>
    %236 = arith.addf %234, %235 : vector<8x128xf32>
    %237 = arith.mulf %236, %229 : vector<8x128xf32>
    %cst_93 = arith.constant -0.284496725 : f32
    %238 = vector.broadcast %cst_93 : f32 to vector<8x128xf32>
    %239 = arith.addf %237, %238 : vector<8x128xf32>
    %240 = arith.mulf %239, %229 : vector<8x128xf32>
    %cst_94 = arith.constant 0.254829586 : f32
    %241 = vector.broadcast %cst_94 : f32 to vector<8x128xf32>
    %242 = arith.addf %240, %241 : vector<8x128xf32>
    %243 = arith.mulf %242, %229 : vector<8x128xf32>
    %cst_95 = arith.constant 0.000000e+00 : f32
    %244 = vector.broadcast %cst_95 : f32 to vector<8x128xf32>
    %245 = arith.subf %244, %224 : vector<8x128xf32>
    %246 = arith.mulf %245, %224 : vector<8x128xf32>
    %247 = math.exp %246 : vector<8x128xf32>
    %248 = arith.mulf %243, %247 : vector<8x128xf32>
    %cst_96 = arith.constant 1.000000e+00 : f32
    %249 = vector.broadcast %cst_96 : f32 to vector<8x128xf32>
    %250 = arith.subf %249, %248 : vector<8x128xf32>
    %cst_97 = arith.constant 0.000000e+00 : f32
    %251 = vector.broadcast %cst_97 : f32 to vector<8x128xf32>
    %252 = arith.cmpf oge, %223, %251 : vector<8x128xf32>
    %cst_98 = arith.constant 0.000000e+00 : f32
    %253 = vector.broadcast %cst_98 : f32 to vector<8x128xf32>
    %254 = arith.subf %253, %250 : vector<8x128xf32>
    %255 = arith.select %252, %250, %254 : vector<8x128xi1>, vector<8x128xf32>
    %cst_99 = arith.constant 1.000000e+00 : f32
    %256 = vector.broadcast %cst_99 : f32 to vector<8x128xf32>
    %257 = arith.addf %256, %255 : vector<8x128xf32>
    %258 = arith.mulf %221, %257 : vector<8x128xf32>
    %c0_100 = arith.constant 0 : index
    %c0_101 = arith.constant 0 : index
    %259 = vector.load %arg12[%c0_100, %c0_101] : memref<8x72xbf16, #tpu.memory_space<vmem>>, vector<8x72xbf16>
    %c0_102 = arith.constant 0 : index
    %c0_103 = arith.constant 0 : index
    %260 = vector.load %arg13[%c0_102, %c0_103] : memref<8x1xf32, #tpu.memory_space<vmem>>, vector<8x1xf32>
    %c0_104 = arith.constant 0 : index
    %c0_105 = arith.constant 0 : index
    %261 = vector.load %arg14[%c0_104, %c0_105] : memref<8x1xf32, #tpu.memory_space<vmem>>, vector<8x1xf32>
    %c11_i32_106 = arith.constant 11 : i32
    %262 = tpu.dynamic_rotate %258 by %c11_i32_106 dim 1 : vector<8x128xf32>, i32 -> vector<8x128xf32>
    %c10_i32_107 = arith.constant 10 : i32
    %263 = tpu.dynamic_rotate %258 by %c10_i32_107 dim 1 : vector<8x128xf32>, i32 -> vector<8x128xf32>
    %c9_i32_108 = arith.constant 9 : i32
    %264 = tpu.dynamic_rotate %258 by %c9_i32_108 dim 1 : vector<8x128xf32>, i32 -> vector<8x128xf32>
    %c1_i32_109 = arith.constant 1 : i32
    %265 = tpu.dynamic_rotate %258 by %c1_i32_109 dim 1 : vector<8x128xf32>, i32 -> vector<8x128xf32>
    %c127_i32_110 = arith.constant 127 : i32
    %266 = tpu.dynamic_rotate %258 by %c127_i32_110 dim 1 : vector<8x128xf32>, i32 -> vector<8x128xf32>
    %c119_i32_111 = arith.constant 119 : i32
    %267 = tpu.dynamic_rotate %258 by %c119_i32_111 dim 1 : vector<8x128xf32>, i32 -> vector<8x128xf32>
    %c118_i32_112 = arith.constant 118 : i32
    %268 = tpu.dynamic_rotate %258 by %c118_i32_112 dim 1 : vector<8x128xf32>, i32 -> vector<8x128xf32>
    %c117_i32_113 = arith.constant 117 : i32
    %269 = tpu.dynamic_rotate %258 by %c117_i32_113 dim 1 : vector<8x128xf32>, i32 -> vector<8x128xf32>
    %270 = tpu.concatenate %262, %263, %264, %265, %258, %266, %267, %268, %269 in 0 : vector<8x128xf32>, vector<8x128xf32>, vector<8x128xf32>, vector<8x128xf32>, vector<8x128xf32>, vector<8x128xf32>, vector<8x128xf32>, vector<8x128xf32>, vector<8x128xf32> -> vector<72x128xf32>
    %271 = arith.truncf %270 : vector<72x128xf32> to vector<72x128xbf16>
    %cst_114 = arith.constant dense<0.000000e+00> : vector<8x128xf32>
    %272 = tpu.matmul %259, %271, %cst_114 {dimension_numbers = #tpu.dot_dimension_numbers<[1], [0], [0], [1], [0, 0, 1, 1], [], []>} : vector<8x72xbf16>, vector<72x128xbf16>, vector<8x128xf32> -> vector<8x128xf32>
    %273 = vector.broadcast %0 : vector<1x128xf32> to vector<8x128xf32>
    %274 = arith.mulf %272, %273 : vector<8x128xf32>
    %275 = arith.mulf %274, %274 : vector<8x128xf32>
    %276 = tpu.concatenate %274, %275 in 0 : vector<8x128xf32>, vector<8x128xf32> -> vector<16x128xf32>
    %cst_115 = arith.constant dense<0.000000e+00> : vector<16xf32>
    %277 = vector.multi_reduction <add>, %276, %cst_115 [1] : vector<16x128xf32> to vector<16xf32>
    %278 = vector.shape_cast %277 : vector<16xf32> to vector<16x1xf32>
    %279 = vector.extract_strided_slice %278 {offsets = [0, 0], sizes = [8, 1], strides = [1, 1]} : vector<16x1xf32> to vector<8x1xf32>
    %280 = vector.shape_cast %279 : vector<8x1xf32> to vector<1x8x1xf32>
    %cst_116 = arith.constant dense<0.000000e+00> : vector<1xf32>
    %281 = vector.multi_reduction <add>, %280, %cst_116 [1, 2] : vector<1x8x1xf32> to vector<1xf32>
    %282 = vector.shape_cast %281 : vector<1xf32> to vector<1x1x1xf32>
    %283 = vector.extract %282[0, 0, 0] : f32 from vector<1x1x1xf32>
    %cst_117 = arith.constant 0.001953125 : f32
    %284 = arith.mulf %283, %cst_117 : f32
    %285 = vector.extract_strided_slice %278 {offsets = [8, 0], sizes = [8, 1], strides = [1, 1]} : vector<16x1xf32> to vector<8x1xf32>
    %286 = vector.shape_cast %285 : vector<8x1xf32> to vector<1x8x1xf32>
    %cst_118 = arith.constant dense<0.000000e+00> : vector<1xf32>
    %287 = vector.multi_reduction <add>, %286, %cst_118 [1, 2] : vector<1x8x1xf32> to vector<1xf32>
    %288 = vector.shape_cast %287 : vector<1xf32> to vector<1x1x1xf32>
    %289 = vector.extract %288[0, 0, 0] : f32 from vector<1x1x1xf32>
    %cst_119 = arith.constant 0.001953125 : f32
    %290 = arith.mulf %289, %cst_119 : f32
    %291 = arith.mulf %284, %284 : f32
    %292 = arith.subf %290, %291 : f32
    %293 = vector.broadcast %284 : f32 to vector<8x128xf32>
    %294 = arith.subf %272, %293 : vector<8x128xf32>
    %cst_120 = arith.constant 9.99999974E-6 : f32
    %295 = arith.addf %292, %cst_120 : f32
    %296 = math.rsqrt %295 : f32
    %297 = vector.broadcast %296 : f32 to vector<8x128xf32>
    %298 = arith.mulf %294, %297 : vector<8x128xf32>
    %299 = vector.broadcast %260 : vector<8x1xf32> to vector<8x128xf32>
    %300 = arith.mulf %298, %299 : vector<8x128xf32>
    %301 = vector.broadcast %261 : vector<8x1xf32> to vector<8x128xf32>
    %302 = arith.addf %300, %301 : vector<8x128xf32>
    %303 = vector.broadcast %0 : vector<1x128xf32> to vector<8x128xf32>
    %304 = arith.mulf %302, %303 : vector<8x128xf32>
    %c0_121 = arith.constant 0 : index
    %c0_122 = arith.constant 0 : index
    %c0_123 = arith.constant 0 : index
    %305 = vector.load %arg15[%c0_121, %c0_122, %c0_123] : memref<1x8x1xf32, #tpu.memory_space<vmem>>, vector<1x8x1xf32>
    %306 = vector.shape_cast %305 : vector<1x8x1xf32> to vector<8x1xf32>
    %307 = vector.broadcast %306 : vector<8x1xf32> to vector<8x128xf32>
    %308 = arith.addf %304, %307 : vector<8x128xf32>
    %c0_124 = arith.constant 0 : index
    %c0_125 = arith.constant 0 : index
    %c0_126 = arith.constant 0 : index
    %309 = vector.load %arg16[%c0_124, %c0_125, %c0_126] : memref<1x8x128xf32, #tpu.memory_space<vmem>>, vector<1x8x128xf32>
    %310 = vector.shape_cast %309 : vector<1x8x128xf32> to vector<8x128xf32>
    %311 = vector.shape_cast %308 : vector<8x128xf32> to vector<1x8x128xf32>
    tpu.vector_store %arg16[%c0_124, %c0_125, %c0_126], %311 {strides = array<i32>} : memref<1x8x128xf32, #tpu.memory_space<vmem>>, vector<1x8x128xf32>,
    return
  }
  func.func @transform_0(%arg0: i32) -> (i32, i32, i32) {
    %c0_i32 = arith.constant 0 : i32
    %c0_i32_0 = arith.constant 0 : i32
    %c0_i32_1 = arith.constant 0 : i32
    return %arg0, %c0_i32, %c0_i32_0 : i32, i32, i32
  }
  func.func @transform_1(%arg0: i32) -> (i32, i32) {
    %c0_i32 = arith.constant 0 : i32
    %c0_i32_0 = arith.constant 0 : i32
    %c0_i32_1 = arith.constant 0 : i32
    return %c0_i32, %c0_i32_0 : i32, i32
  }
  func.func @transform_2(%arg0: i32) -> (i32, i32) {
    %c0_i32 = arith.constant 0 : i32
    %c0_i32_0 = arith.constant 0 : i32
    %c0_i32_1 = arith.constant 0 : i32
    return %c0_i32, %c0_i32_0 : i32, i32
  }
  func.func @transform_3(%arg0: i32) -> (i32, i32) {
    %c0_i32 = arith.constant 0 : i32
    %c0_i32_0 = arith.constant 0 : i32
    %c0_i32_1 = arith.constant 0 : i32
    return %c0_i32, %c0_i32_0 : i32, i32
  }
  func.func @transform_4(%arg0: i32) -> (i32, i32) {
    %c0_i32 = arith.constant 0 : i32
    %c0_i32_0 = arith.constant 0 : i32
    %c0_i32_1 = arith.constant 0 : i32
    return %c0_i32, %c0_i32_0 : i32, i32
  }
  func.func @transform_5(%arg0: i32) -> (i32, i32) {
    %c0_i32 = arith.constant 0 : i32
    %c0_i32_0 = arith.constant 0 : i32
    %c0_i32_1 = arith.constant 0 : i32
    return %c0_i32, %c0_i32_0 : i32, i32
  }
  func.func @transform_6(%arg0: i32) -> (i32, i32) {
    %c0_i32 = arith.constant 0 : i32
    %c0_i32_0 = arith.constant 0 : i32
    %c0_i32_1 = arith.constant 0 : i32
    return %c0_i32, %c0_i32_0 : i32, i32
  }
  func.func @transform_7(%arg0: i32) -> (i32, i32) {
    %c0_i32 = arith.constant 0 : i32
    %c0_i32_0 = arith.constant 0 : i32
    %c0_i32_1 = arith.constant 0 : i32
    return %c0_i32, %c0_i32_0 : i32, i32
  }
  func.func @transform_8(%arg0: i32) -> (i32, i32) {
    %c0_i32 = arith.constant 0 : i32
    %c0_i32_0 = arith.constant 0 : i32
    %c0_i32_1 = arith.constant 0 : i32
    return %c0_i32, %c0_i32_0 : i32, i32
  }
  func.func @transform_9(%arg0: i32) -> (i32, i32) {
    %c0_i32 = arith.constant 0 : i32
    %c0_i32_0 = arith.constant 0 : i32
    %c0_i32_1 = arith.constant 0 : i32
    return %c0_i32, %c0_i32_0 : i32, i32
  }
  func.func @transform_10(%arg0: i32) -> (i32, i32) {
    %c0_i32 = arith.constant 0 : i32
    %c0_i32_0 = arith.constant 0 : i32
    %c0_i32_1 = arith.constant 0 : i32
    return %c0_i32, %c0_i32_0 : i32, i32
  }
  func.func @transform_11(%arg0: i32) -> (i32, i32) {
    %c0_i32 = arith.constant 0 : i32
    %c0_i32_0 = arith.constant 0 : i32
    %c0_i32_1 = arith.constant 0 : i32
    return %c0_i32, %c0_i32_0 : i32, i32
  }
  func.func @transform_12(%arg0: i32) -> (i32, i32) {
    %c0_i32 = arith.constant 0 : i32
    %c0_i32_0 = arith.constant 0 : i32
    %c0_i32_1 = arith.constant 0 : i32
    return %c0_i32, %c0_i32_0 : i32, i32
  }
  func.func @transform_13(%arg0: i32) -> (i32, i32) {
    %c0_i32 = arith.constant 0 : i32
    %c0_i32_0 = arith.constant 0 : i32
    %c0_i32_1 = arith.constant 0 : i32
    return %c0_i32, %c0_i32_0 : i32, i32
  }
  func.func @transform_14(%arg0: i32) -> (i32, i32, i32) {
    %c0_i32 = arith.constant 0 : i32
    %c0_i32_0 = arith.constant 0 : i32
    %c0_i32_1 = arith.constant 0 : i32
    return %arg0, %c0_i32, %c0_i32_0 : i32, i32, i32
  }
  func.func @transform_15(%arg0: i32) -> (i32, i32, i32) {
    %c0_i32 = arith.constant 0 : i32
    %c0_i32_0 = arith.constant 0 : i32
    %c0_i32_1 = arith.constant 0 : i32
    return %arg0, %c0_i32, %c0_i32_0 : i32, i32, i32
  }
}

</mosaic_0001>

<bundles_post_ra>
// kernel: down_forward.1
= control target key start
LH: loop header
LB: loop body
LE: loop exit
PB: predicated region body
PF: predicated region fallthrough
CT: control target
= control target key end

     0   :  { %s1451_s18 = smov 0   ;;  %s1623_s0 = inlined_call_operand.vmem [shape: f32[2,4,128], index: 0, kind: input, shape index: {}]   ;;  %s1624_s1 = inlined_call_operand.vmem [shape: f32[1,128], index: 1, kind: input, shape index: {}]   ;;  %s1625_s2 = inlined_call_operand.vmem [shape: bf16[4,36], index: 2, kind: input, shape index: {}]   ;;  %s1626_s3 = inlined_call_operand.vmem [shape: f32[4,1], index: 3, kind: input, shape index: {}]   ;;  %s1627_s4 = inlined_call_operand.vmem [shape: f32[4,1], index: 4, kind: input, shape index: {}]   ;;  %s1628_s5 = inlined_call_operand.vmem [shape: bf16[4,36], index: 5, kind: input, shape index: {}]   ;;  %s1629_s6 = inlined_call_operand.vmem [shape: f32[4,1], index: 6, kind: input, shape index: {}]   ;;  %s1630_s7 = inlined_call_operand.vmem [shape: f32[4,1], index: 7, kind: input, shape index: {}]   ;;  %s1631_s8 = inlined_call_operand.vmem [shape: bf16[8,36], index: 8, kind: input, shape index: {}]   ;;  %s1632_s9 = inlined_call_operand.vmem [shape: f32[8,1], index: 9, kind: input, shape index: {}]   ;;  %s1633_s10 = inlined_call_operand.vmem [shape: f32[8,1], index: 10, kind: input, shape index: {}]   ;;  %s1634_s11 = inlined_call_operand.vmem [shape: bf16[8,72], index: 11, kind: input, shape index: {}]   ;;  %s1635_s12 = inlined_call_operand.vmem [shape: f32[8,1], index: 12, kind: input, shape index: {}]   ;;  %s1636_s13 = inlined_call_operand.vmem [shape: f32[8,1], index: 13, kind: input, shape index: {}]   ;;  %s1637_s14 = inlined_call_operand.vmem [shape: f32[2,8,1], index: 14, kind: input, shape index: {}]   ;;  %s1638_s15 = inlined_call_operand.vmem [shape: f32[2,8,128], index: 15, kind: output, shape index: {}]  }
   0x1   :  { %1653 = sst [smem:[#allocation2_spill]] %s1623_s0 }
   0x2 LB: > { %s1210_s19 = sadd.s32 4294967295, %s1358_s18   ;;  %p1214_p0 = scmp.ge.s32.totalorder %s1358_s18, 1  ;;  %s1358_s18 = sphi %s1451_s18, %s25_s18  }
   0x3   : > { %p445_p1 = scmp.lt.s32.totalorder %s1358_s18, 3 }
   0x5   : > { %p446_p2 = pnand %p1214_p0, %p445_p1 }
   0x6   : > { %p495_p3 = scmp.lt.s32.totalorder (!%p446_p2), %s1210_s19, 1  ;;  %v1360_v0 = vmov (!%p446_p2), 0.0   ;;  %s1654_s0 = sld [smem:[#allocation2_spill]] (!%p446_p2)  ;;  %vm1365_vm0 = vmmov (!%p446_p2), 0   ;;  %vm541_vm1 = vcmask (!%p446_p2), 1043456   ;;  %vm553_vm2 = vcmask (!%p446_p2), 1041408  }
   0x7   : > { %449 = sbr.rel (%p446_p2) target bundleno = 3309 (0xced), region = 80  ;;  %1243 = vmatprep.subr.bf16.mxu0 (!%p446_p2), %v1360_v0  ;;  %1253 = vmatprep.subr.bf16.mxu1 (!%p446_p2), %v1360_v0  ;;  %s1651_s24 = smov (!%p446_p2), 10   ;;  %v510_v22 = vld [vmem:[%s1625_s2] sm:$0x3] (!%p446_p2)  ;;  %vm549_vm3 = vcmask (!%p446_p2), 293888   ;;  %vm611_vm4 = vcmask (!%p446_p2), 3072  }
   0x8   : > { %s1652_s25 = smov (!%p446_p2), 11   ;;  %s1649_s26 = smov (!%p446_p2), 1   ;;  %1249 = vmatprep.mubr.msk.bf16.mxu0 (!%p446_p2), %vm1365_vm0, %v1360_v0  ;;  %1259 = vmatprep.mubr.msk.bf16.mxu1 (!%p446_p2), %vm1365_vm0, %v1360_v0  ;;  %v1507_v23 = vld [vmem:[%s1624_s1] ss:$0 sm:$0xff] (!%p446_p2)  ;;  %v1370_v36 = vmov (!%p446_p2), 0   ;;  %vm943_vm7 = vcmask (!%p446_p2), 7168  }
   0x9   : > { %s1647_s27 = smov (!%p446_p2), 9   ;;  %s1643_s28 = smov (!%p446_p2), 127   ;;  %1330 = vset.pattern.permute.xlu0 (!%p446_p2), %v1370_v36  ;;  %1331 = vset.pattern.permute.xlu1 (!%p446_p2), %v1370_v36  ;;  %v512_v37 = vld [vmem:[%s1627_s4] sm:$0xf] (!%p446_p2)  ;;  %vm1039_vm9 = vcmask (!%p446_p2), 588800  }
   0xa   : > { %s1641_s29 = smov (!%p446_p2), 118   ;;  %s1639_s30 = smov (!%p446_p2), 119   ;;  %v511_v38 = vld [vmem:[%s1626_s3] sm:$0xf] (!%p446_p2) }
   0xb   : > { %s1645_s16 = smov (!%p446_p2), 117  }
   0xe   : > { %s1664_s19 = smov (!%p495_p3, %s1210_s19), 1 }
   0xf   : > { %s1215_s20 = sshll.u32 %s1664_s19, 2 }
  0x10   : > { %s498_s23 = scalar_lea.vmem %s1654_s0, %s1215_s20 }
  0x11   : > { %v1467_v1 = vld [vmem:[%s498_s23] sm:$0xf] }
  0x12   : > { %515 = vrot.lane.b32.xlu0 %v1467_v1, %s1651_s24  ;;  %513 = vrot.lane.b32.xlu1 %v1467_v1, %s1652_s25 }
  0x16   : > { %519 = vrot.lane.b32.xlu0 %v1467_v1, %s1649_s26  ;;  %517 = vrot.lane.b32.xlu1 %v1467_v1, %s1647_s27 }
  0x1a   : > { %521 = vrot.lane.b32.xlu0 %v1467_v1, %s1643_s28  ;;  %525 = vrot.lane.b32.xlu1 %v1467_v1, %s1641_s29 }
  0x1e   : > { %523 = vrot.lane.b32.xlu0 %v1467_v1, %s1639_s30  ;;  %527 = vrot.lane.b32.xlu1 %v1467_v1, %s1645_s16 }
  0x84   : > { %v516_v2 = vpop.permute.xlu0 %515  ;;  %v514_v3 = vpop.permute.xlu1 %513 }
  0x85   : > { %v530_v4 = vrot.slane %v516_v2, 4 }
  0x87   : > { %v542_v8 = vsel %vm541_vm1, %v514_v3, %v530_v4 }
  0x88   : > { %v520_v5 = vpop.permute.xlu0 %519  ;;  %v518_v6 = vpop.permute.xlu1 %517 }
  0x89   : > { %v533_v7 = vrot.slane %v520_v5, 4 }
  0x8b   : > { %v543_v9 = vsel %vm541_vm1, %v518_v6, %v533_v7 }
  0x8c   : > { %v522_v10 = vpop.permute.xlu0 %521  ;;  %v526_v11 = vpop.permute.xlu1 %525  ;;  %v546_v12 = vpack.c.bf16 %v543_v9, %v542_v8 }
  0x8d   : > { %v536_v13 = vrot.slane %v522_v10, 4  ;;  %v539_v14 = vrot.slane %v526_v11, 4 }
  0x8e   : > { %1244 = vmatpush3.bf16.msra.mxu0 %v546_v12 }
  0x8f   : > { %1245 = vmatprep.subr.bf16.mxu0 %v1360_v0  ;;  %v544_v17 = vsel %vm541_vm1, %v1467_v1, %v536_v13 }
  0x90   : > { %v524_v15 = vpop.permute.xlu0 %523  ;;  %v528_v16 = vpop.permute.xlu1 %527 }
  0x91   : > { %v545_v18 = vsel %vm541_vm1, %v524_v15, %v539_v14  ;;  %v548_v19 = vpack.c.bf16 %v528_v16, %v528_v16 }
  0x92   : > { %v547_v20 = vpack.c.bf16 %v545_v18, %v544_v17 }
  0x93   : > { %v555_v21 = vsel %vm553_vm2, %v548_v19, 0 }
  0x94   : > { %1246 = vmatpush3.bf16.msra.mxu0 %v547_v20 }
  0x95   : > { %1247 = vmatprep.subr.bf16.mxu0 %v1360_v0 }
  0x98   : > { %1248 = vmatpush3.bf16.msra.mxu0 %v555_v21 }
  0x99   : > { %1263 = vmatprep.subr.bf16.mxu0 %v1360_v0 }
  0x9b   : > { %1250 = vmatmul.mubr.msk.bf16.vlgmr.msra.gmra.mrb[0].mxu0 %vm549_vm3, %v510_v22 }
  0x9c   : > { %1269 = vmatprep.mubr.msk.bf16.mxu0 %vm1365_vm0, %v1360_v0 }
 0x16e   : > { %v591_v24 = vpop.f32.mrb[0].mxu0 }
 0x16f   : > { %v603_v25 = vmul.f32 %v1507_v23, %v591_v24  ;;  %v1251_v26 = vpop.f32.mrb[1].mxu0 }
 0x170   : > { %v594_v27 = vpop.f32.mrb[2].mxu0 }
 0x171   : > { %v604_v28 = vmul.f32 %v603_v25, %v603_v25  ;;  %v1252_v29 = vpop.f32.mrb[3].mxu0 }
 0x173   : > { %v606_v30 = vrot.slane %v604_v28, 4 }
 0x175   : > { %v608_v31 = vsel %vm541_vm1, %v603_v25, %v606_v30 }
 0x176   : > { %609 = vadd.xlane.f32.xlu0 %v608_v31 }
 0x203   : > { %v610_v32 = vpop.xlane.xlu0 %609 }
 0x204   : > { %v624_v33 = vrot.slane %v610_v32, 4  ;;  %v612_v34 = vsel %vm611_vm4, %v610_v32, 0.0 }
 0x205   : > { %613 = vadd.xlane.f32.xlu1 %v612_v34 }
 0x206   : > { %v626_v35 = vsel %vm611_vm4, %v624_v33, 0.0 }
 0x207   : > { %627 = vadd.xlane.f32.xlu0 %v626_v35 }
 0x216   : > { %655 = vperm.xlu1 %1331, %v512_v37  }
 0x21d   : > { %649 = vperm.xlu0 %1330, %v511_v38  }
 0x292   : > { %v614_v39 = vpop.xlane.xlu1 %613 }
 0x293   : > { %v615_v40 = vrot.slane %v614_v39, 4 }
 0x294   : > { %v628_v41 = vpop.xlane.xlu0 %627 }
 0x295   : > { %v616_v42 = vadd.f32 %v615_v40, %v614_v39  ;;  %v629_v43 = vrot.slane %v628_v41, 4 }
 0x296   : > { %v656_v60 = vpop.permute.xlu1 %655 }
 0x297   : > { %v617_v44 = vrot.slane %v616_v42, 2  ;;  %v630_v45 = vadd.f32 %v629_v43, %v628_v41 }
 0x299   : > { %v631_v46 = vrot.slane %v630_v45, 2  ;;  %v618_v47 = vadd.f32 %v617_v44, %v616_v42 }
 0x29b   : > { %v619_v48 = vrot.slane %v618_v47, 1  ;;  %v632_v49 = vadd.f32 %v631_v46, %v630_v45 }
 0x29c   : > { %v650_v58 = vpop.permute.xlu0 %649 }
 0x29d   : > { %v620_v50 = vadd.f32 %v619_v48, %v618_v47  ;;  %v633_v51 = vrot.slane %v632_v49, 1  ;;  %v686_v48 = vld [vmem:[%s1628_s5] sm:$0x3] }
 0x29f   : > { %1287 = vpush %v620_v50  ;;  %v634_v52 = vadd.f32 %v633_v51, %v632_v49 }
 0x2a1   : > { %1289 = vpush %v634_v52 }
 0x2d0   : > { %s1288_s22 = spop %1287 }
 0x2d1   : > { %s622_s23 = smul.f32 0.00390625, %s1288_s22 }
 0x2d2   : > { %s1290_s17 = spop %1289 }
 0x2d3   : > { %s637_s20 = smul.f32 %s622_s23, %s622_s23  ;;  %v639_v53 = vstv %s622_s23 }
 0x2d4   : > { %s636_s21 = smul.f32 0.00390625, %s1290_s17  ;;  %v640_v54 = vsub.f32 %v591_v24, %v639_v53 }
 0x2d6   : > { %s638_s30 = ssub.f32 %s636_s21, %s637_s20 }
 0x2d8   : > { %s641_s29 = sadd.f32 1e-05, %s638_s30  ;;  %s1657_s30 = smov 119  }
 0x2da   : > { %v642_v55 = vstv %s641_s29  ;;  %s1656_s29 = smov 118  }
 0x2db   : > { %1332 = vrsqrt.f32 %v642_v55 }
 0x2e5   : > { %v1333_v56 = vpop.eup %1332 }
 0x2e6   : > { %1291 = vpush %v1333_v56 }
 0x317   : > { %s1292_s28 = spop %1291 }
 0x318   : > { %v645_v57 = vstv %s1292_s28  ;;  %s1655_s28 = smov 127  }
 0x319   : > { %v646_v59 = vmul.f32 %v645_v57, %v640_v54  ;;  %v687_v57 = vld [vmem:[%s1629_s6] sm:$0xf] }
 0x31b   : > { %v652_v61 = vmul.f32 %v650_v58, %v646_v59 }
 0x31d   : > { %v658_v62 = vadd.f32 %v656_v60, %v652_v61 }
 0x31f   : > { %v659_v63 = vmul.f32 %v1507_v23, %v658_v62  ;;  %v688_v62 = vld [vmem:[%s1630_s7] sm:$0xf] }
 0x321   : > { %v661_v2 = vmul.f32 0.70710677, %v659_v63  ;;  %v660_v25 = vmul.f32 0.5, %v659_v63 }
 0x323   : > { %v662_v3 = vand.u32 2147483647, %v661_v2  ;;  %vm681_vm5 = vcmp.ge.f32.partialorder %v661_v2, 0.0 }
 0x325   : > { %v663_v4 = vmul.f32 0.3275911, %v662_v3  ;;  %v675_v6 = vsub.f32 0.0, %v662_v3 }
 0x327   : > { %v664_v5 = vadd.f32 1.0, %v663_v4  ;;  %v676_v8 = vmul.f32 %v675_v6, %v662_v3 }
 0x329   : > { %1334 = vrcp.f32 %v664_v5  ;;  %v677_v11 = vmul.f32 1.442695, %v676_v8 }
 0x32b   : > { %1336 = vpow2.f32 %v677_v11 }
 0x333   : > { %v1335_v7 = vpop.eup %1334 }
 0x334   : > { %v666_v9 = vmul.f32 1.0614054, %v1335_v7 }
 0x335   : > { %v1337_v19 = vpop.eup %1336 }
 0x336   : > { %v667_v10 = vadd.f32 -1.4531521, %v666_v9 }
 0x338   : > { %v668_v12 = vmul.f32 %v1335_v7, %v667_v10 }
 0x33a   : > { %v669_v13 = vadd.f32 1.4214138, %v668_v12 }
 0x33c   : > { %v670_v14 = vmul.f32 %v1335_v7, %v669_v13 }
 0x33e   : > { %v671_v15 = vadd.f32 -0.28449672, %v670_v14 }
 0x340   : > { %v672_v16 = vmul.f32 %v1335_v7, %v671_v15 }
 0x342   : > { %v673_v17 = vadd.f32 0.2548296, %v672_v16 }
 0x344   : > { %v674_v18 = vmul.f32 %v1335_v7, %v673_v17 }
 0x346   : > { %v679_v20 = vmul.f32 %v1337_v19, %v674_v18 }
 0x348   : > { %v680_v21 = vsub.f32 1.0, %v679_v20 }
 0x34a   : > { %v682_v22 = vsub.f32 0.0, %v680_v21 }
 0x34c   : > { %v683_v24 = vsel %vm681_vm5, %v680_v21, %v682_v22 }
 0x34d   : > { %v684_v26 = vadd.f32 1.0, %v683_v24 }
 0x34f   : > { %v685_v27 = vmul.f32 %v684_v26, %v660_v25 }
 0x351   : > { %703 = vrot.lane.b32.xlu0 %v685_v27, %s1645_s16  ;;  %691 = vrot.lane.b32.xlu1 %v685_v27, %s1651_s24 }
 0x355   : > { %695 = vrot.lane.b32.xlu1 %v685_v27, %s1649_s26 }
 0x359   : > { %689 = vrot.lane.b32.xlu1 %v685_v27, %s1652_s25 }
 0x35d   : > { %693 = vrot.lane.b32.xlu1 %v685_v27, %s1647_s27 }
 0x361   : > { %697 = vrot.lane.b32.xlu1 %v685_v27, %s1655_s28 }
 0x365   : > { %701 = vrot.lane.b32.xlu1 %v685_v27, %s1656_s29 }
 0x369   : > { %699 = vrot.lane.b32.xlu1 %v685_v27, %s1657_s30 }
 0x3c3   : > { %v692_v28 = vpop.permute.xlu1 %691  ;;  %v704_v41 = vpop.permute.xlu0 %703 }
 0x3c4   : > { %v706_v31 = vrot.slane %v692_v28, 4  ;;  %v723_v46 = vpack.c.bf16 %v704_v41, %v704_v41 }
 0x3c6   : > { %v728_v47 = vsel %vm553_vm2, %v723_v46, 0 }
 0x3c7   : > { %v696_v29 = vpop.permute.xlu1 %695 }
 0x3c8   : > { %v709_v32 = vrot.slane %v696_v29, 4 }
 0x3cb   : > { %v690_v30 = vpop.permute.xlu1 %689 }
 0x3cc   : > { %v717_v34 = vsel %vm541_vm1, %v690_v30, %v706_v31 }
 0x3cf   : > { %v694_v33 = vpop.permute.xlu1 %693 }
 0x3d0   : > { %v718_v35 = vsel %vm541_vm1, %v694_v33, %v709_v32 }
 0x3d1   : > { %v721_v36 = vpack.c.bf16 %v718_v35, %v717_v34 }
 0x3d3   : > { %1254 = vmatpush3.bf16.msra.mxu1 %v721_v36  ;;  %v698_v37 = vpop.permute.xlu1 %697 }
 0x3d4   : > { %1255 = vmatprep.subr.bf16.mxu1 %v1360_v0  ;;  %v712_v39 = vrot.slane %v698_v37, 4 }
 0x3d6   : > { %v719_v43 = vsel %vm541_vm1, %v685_v27, %v712_v39 }
 0x3d7   : > { %v702_v38 = vpop.permute.xlu1 %701 }
 0x3d8   : > { %v715_v40 = vrot.slane %v702_v38, 4 }
 0x3db   : > { %v700_v42 = vpop.permute.xlu1 %699 }
 0x3dc   : > { %v720_v44 = vsel %vm541_vm1, %v700_v42, %v715_v40 }
 0x3dd   : > { %v722_v45 = vpack.c.bf16 %v720_v44, %v719_v43 }
 0x3df   : > { %1256 = vmatpush3.bf16.msra.mxu1 %v722_v45 }
 0x3e0   : > { %1257 = vmatprep.subr.bf16.mxu1 %v1360_v0 }
 0x3e3   : > { %1258 = vmatpush3.bf16.msra.mxu1 %v728_v47 }
 0x3e4   : > { %1273 = vmatprep.subr.bf16.mxu1 %v1360_v0 }
 0x3e6   : > { %1260 = vmatmul.mubr.msk.bf16.vlgmr.msra.gmra.mrb[0].mxu1 %vm549_vm3, %v686_v48 }
 0x3e7   : > { %1283 = vmatprep.mubr.msk.bf16.mxu1 %vm1365_vm0, %v1360_v0 }
 0x4b9   : > { %v764_v49 = vpop.f32.mrb[0].mxu1 }
 0x4ba   : > { %v770_v50 = vmul.f32 %v1507_v23, %v764_v49  ;;  %v1261_v51 = vpop.f32.mrb[1].mxu1 }
 0x4bb   : > { %v767_v52 = vpop.f32.mrb[2].mxu1 }
 0x4bc   : > { %v771_v53 = vmul.f32 %v770_v50, %v770_v50  ;;  %v1262_v54 = vpop.f32.mrb[3].mxu1 }
 0x4be   : > { %v773_v55 = vrot.slane %v771_v53, 4 }
 0x4c0   : > { %v775_v56 = vsel %vm541_vm1, %v770_v50, %v773_v55 }
 0x4c1   : > { %776 = vadd.xlane.f32.xlu1 %v775_v56 }
 0x4d2   : > { %815 = vperm.xlu1 %1331, %v687_v57  }
 0x54e   : > { %v777_v58 = vpop.xlane.xlu1 %776 }
 0x54f   : > { %v790_v59 = vrot.slane %v777_v58, 4  ;;  %v778_v60 = vsel %vm611_vm4, %v777_v58, 0.0 }
 0x550   : > { %779 = vadd.xlane.f32.xlu0 %v778_v60 }
 0x551   : > { %v792_v61 = vsel %vm611_vm4, %v790_v59, 0.0 }
 0x552   : > { %v816_v21 = vpop.permute.xlu1 %815 }
 0x554   : > { %793 = vadd.xlane.f32.xlu0 %v792_v61 }
 0x56a   : > { %821 = vperm.xlu0 %1330, %v688_v62  }
 0x5dd   : > { %v780_v63 = vpop.xlane.xlu0 %779 }
 0x5de   : > { %v781_v2 = vrot.slane %v780_v63, 4 }
 0x5e0   : > { %v782_v3 = vadd.f32 %v781_v2, %v780_v63 }
 0x5e1   : > { %v794_v4 = vpop.xlane.xlu0 %793 }
 0x5e2   : > { %v783_v5 = vrot.slane %v782_v3, 2  ;;  %v795_v6 = vrot.slane %v794_v4, 4 }
 0x5e4   : > { %v796_v7 = vadd.f32 %v795_v6, %v794_v4  ;;  %v784_v8 = vadd.f32 %v783_v5, %v782_v3 }
 0x5e6   : > { %v797_v9 = vrot.slane %v796_v7, 2  ;;  %v785_v10 = vrot.slane %v784_v8, 1 }
 0x5e8   : > { %v786_v11 = vadd.f32 %v785_v10, %v784_v8  ;;  %v798_v12 = vadd.f32 %v797_v9, %v796_v7  ;;  %v853_v10 = vld [vmem:[%s1631_s8] sm:$0xf] }
 0x5e9   : > { %v822_v24 = vpop.permute.xlu0 %821 }
 0x5ea   : > { %1293 = vpush %v786_v11  ;;  %v799_v13 = vrot.slane %v798_v12, 1 }
 0x5ec   : > { %v800_v14 = vadd.f32 %v799_v13, %v798_v12 }
 0x5ee   : > { %1295 = vpush %v800_v14 }
 0x61b   : > { %s1294_s23 = spop %1293 }
 0x61c   : > { %s788_s17 = smul.f32 0.00390625, %s1294_s23 }
 0x61e   : > { %v805_v15 = vstv %s788_s17  ;;  %s803_s20 = smul.f32 %s788_s17, %s788_s17 }
 0x61f   : > { %s1296_s21 = spop %1295  ;;  %v806_v16 = vsub.f32 %v764_v49, %v805_v15 }
 0x620   : > { %s802_s22 = smul.f32 0.00390625, %s1296_s21 }
 0x622   : > { %s804_s16 = ssub.f32 %s802_s22, %s803_s20 }
 0x624   : > { %s807_s27 = sadd.f32 1e-05, %s804_s16  ;;  %s1660_s16 = smov 117  }
 0x626   : > { %v808_v17 = vstv %s807_s27  ;;  %s1659_s27 = smov 9  }
 0x627   : > { %1338 = vrsqrt.f32 %v808_v17  ;;  %v854_v17 = vld [vmem:[%s1632_s9] sm:$0xff] }
 0x631   : > { %v1339_v18 = vpop.eup %1338 }
 0x632   : > { %1297 = vpush %v1339_v18 }
 0x663   : > { %s1298_s26 = spop %1297 }
 0x664   : > { %v811_v19 = vstv %s1298_s26  ;;  %s1658_s26 = smov 1  }
 0x665   : > { %v812_v20 = vmul.f32 %v811_v19, %v806_v16 }
 0x667   : > { %v818_v22 = vmul.f32 %v816_v21, %v812_v20 }
 0x669   : > { %v824_v25 = vadd.f32 %v822_v24, %v818_v22  ;;  %v855_v22 = vld [vmem:[%s1633_s10] sm:$0xff] }
 0x66b   : > { %v825_v26 = vmul.f32 %v1507_v23, %v824_v25 }
 0x66d   : > { %v826_v27 = vadd.f32 %v825_v26, %v1467_v1 }
 0x66f   : > { %v828_v28 = vmul.f32 0.70710677, %v826_v27  ;;  %v827_v49 = vmul.f32 0.5, %v826_v27 }
 0x671   : > { %v829_v29 = vand.u32 2147483647, %v828_v28  ;;  %vm848_vm6 = vcmp.ge.f32.partialorder %v828_v28, 0.0 }
 0x673   : > { %v830_v30 = vmul.f32 0.3275911, %v829_v29  ;;  %v842_v32 = vsub.f32 0.0, %v829_v29 }
 0x675   : > { %v831_v31 = vadd.f32 1.0, %v830_v30  ;;  %v843_v34 = vmul.f32 %v842_v32, %v829_v29 }
 0x677   : > { %1340 = vrcp.f32 %v831_v31  ;;  %v844_v37 = vmul.f32 1.442695, %v843_v34 }
 0x679   : > { %1342 = vpow2.f32 %v844_v37 }
 0x681   : > { %v1341_v33 = vpop.eup %1340 }
 0x682   : > { %v833_v35 = vmul.f32 1.0614054, %v1341_v33 }
 0x683   : > { %v1343_v1 = vpop.eup %1342 }
 0x684   : > { %v834_v36 = vadd.f32 -1.4531521, %v833_v35 }
 0x686   : > { %v835_v38 = vmul.f32 %v1341_v33, %v834_v36 }
 0x688   : > { %v836_v39 = vadd.f32 1.4214138, %v835_v38 }
 0x68a   : > { %v837_v40 = vmul.f32 %v1341_v33, %v836_v39 }
 0x68c   : > { %v838_v41 = vadd.f32 -0.28449672, %v837_v40 }
 0x68e   : > { %v839_v42 = vmul.f32 %v1341_v33, %v838_v41 }
 0x690   : > { %v840_v43 = vadd.f32 0.2548296, %v839_v42 }
 0x692   : > { %v841_v44 = vmul.f32 %v1341_v33, %v840_v43 }
 0x694   : > { %v846_v45 = vmul.f32 %v1343_v1, %v841_v44 }
 0x696   : > { %v847_v46 = vsub.f32 1.0, %v846_v45 }
 0x698   : > { %v849_v47 = vsub.f32 0.0, %v847_v46 }
 0x69a   : > { %v850_v48 = vsel %vm848_vm6, %v847_v46, %v849_v47 }
 0x69b   : > { %v851_v50 = vadd.f32 1.0, %v850_v48 }
 0x69d   : > { %v852_v51 = vmul.f32 %v851_v50, %v827_v49 }
 0x69f   : > { %856 = vrot.lane.b32.xlu0 %v852_v51, %s1652_s25  ;;  %858 = vrot.lane.b32.xlu1 %v852_v51, %s1651_s24 }
 0x6a3   : > { %864 = vrot.lane.b32.xlu0 %v852_v51, %s1655_s28  ;;  %862 = vrot.lane.b32.xlu1 %v852_v51, %s1658_s26 }
 0x6a7   : > { %866 = vrot.lane.b32.xlu0 %v852_v51, %s1657_s30  ;;  %860 = vrot.lane.b32.xlu1 %v852_v51, %s1659_s27 }
 0x6ab   : > { %868 = vrot.lane.b32.xlu1 %v852_v51, %s1656_s29 }
 0x6af   : > { %870 = vrot.lane.b32.xlu1 %v852_v51, %s1660_s16 }
 0x711   : > { %v859_v52 = vpop.permute.xlu1 %858  ;;  %v857_v53 = vpop.permute.xlu0 %856 }
 0x712   : > { %v873_v55 = vrot.slane %v859_v52, 4 }
 0x714   : > { %v884_v59 = vsel %vm541_vm1, %v857_v53, %v873_v55 }
 0x715   : > { %v863_v54 = vpop.permute.xlu1 %862  ;;  %v865_v57 = vpop.permute.xlu0 %864 }
 0x716   : > { %v876_v56 = vrot.slane %v863_v54, 4  ;;  %v879_v62 = vrot.slane %v865_v57, 4 }
 0x718   : > { %v886_v4 = vsel %vm541_vm1, %v852_v51, %v879_v62 }
 0x719   : > { %v861_v58 = vpop.permute.xlu1 %860  ;;  %v867_v3 = vpop.permute.xlu0 %866 }
 0x71a   : > { %v885_v60 = vsel %vm541_vm1, %v861_v58, %v876_v56 }
 0x71b   : > { %v888_v61 = vpack.c.bf16 %v885_v60, %v884_v59 }
 0x71d   : > { %1264 = vmatpush3.bf16.msra.mxu0 %v888_v61  ;;  %v869_v63 = vpop.permute.xlu1 %868 }
 0x71e   : > { %v882_v2 = vrot.slane %v869_v63, 4  ;;  %1265 = vmatprep.subr.bf16.mxu0 %v1360_v0 }
 0x720   : > { %v887_v5 = vsel %vm541_vm1, %v867_v3, %v882_v2 }
 0x721   : > { %v889_v6 = vpack.c.bf16 %v887_v5, %v886_v4  ;;  %v871_v7 = vpop.permute.xlu1 %870 }
 0x722   : > { %v890_v8 = vpack.c.bf16 %v871_v7, %v871_v7 }
 0x723   : > { %1266 = vmatpush3.bf16.msra.mxu0 %v889_v6 }
 0x724   : > { %1267 = vmatprep.subr.bf16.mxu0 %v1360_v0  ;;  %v895_v9 = vsel %vm553_vm2, %v890_v8, 0 }
 0x727   : > { %1268 = vmatpush3.bf16.msra.mxu0 %v895_v9 }
 0x72a   : > { %1270 = vmatmul.mubr.msk.bf16.vlgmr.msra.gmra.mrb[4].mxu0 %vm549_vm3, %v853_v10 }
 0x7fd   : > { %v931_v11 = vpop.f32.mrb[4].mxu0 }
 0x7fe   : > { %v1271_v12 = vpop.f32.mrb[5].mxu0  ;;  %v937_v13 = vmul.f32 %v1507_v23, %v931_v11 }
 0x7ff   : > { %v934_v14 = vpop.f32.mrb[6].mxu0 }
 0x800   : > { %939 = vadd.xlane.f32.xlu0 %v937_v13  ;;  %v1272_v15 = vpop.f32.mrb[7].mxu0  ;;  %v938_v16 = vmul.f32 %v937_v13, %v937_v13 }
 0x802   : > { %941 = vadd.xlane.f32.xlu1 %v938_v16 }
 0x813   : > { %978 = vperm.xlu1 %1331, %v854_v17  }
 0x88d   : > { %v940_v18 = vpop.xlane.xlu0 %939 }
 0x88e   : > { %v944_v19 = vsel %vm943_vm7, %v940_v18, 0.0 }
 0x88f   : > { %945 = vadd.xlane.f32.xlu0 %v944_v19  ;;  %v942_v20 = vpop.xlane.xlu1 %941 }
 0x890   : > { %v955_v21 = vsel %vm943_vm7, %v942_v20, 0.0 }
 0x893   : > { %956 = vadd.xlane.f32.xlu0 %v955_v21  ;;  %v979_v44 = vpop.permute.xlu1 %978 }
 0x8a9   : > { %984 = vperm.xlu0 %1330, %v855_v22  }
 0x91c   : > { %v946_v24 = vpop.xlane.xlu0 %945 }
 0x91d   : > { %v947_v25 = vrot.slane %v946_v24, 4 }
 0x91f   : > { %v948_v26 = vadd.f32 %v947_v25, %v946_v24 }
 0x920   : > { %v957_v27 = vpop.xlane.xlu0 %956 }
 0x921   : > { %v949_v28 = vrot.slane %v948_v26, 2  ;;  %v958_v29 = vrot.slane %v957_v27, 4 }
 0x923   : > { %v959_v30 = vadd.f32 %v958_v29, %v957_v27  ;;  %v950_v31 = vadd.f32 %v949_v28, %v948_v26  ;;  %v1015_v26 = vld [vmem:[%s1634_s11] sm:$0xf] }
 0x925   : > { %v960_v32 = vrot.slane %v959_v30, 2  ;;  %v951_v33 = vrot.slane %v950_v31, 1 }
 0x927   : > { %v952_v34 = vadd.f32 %v951_v33, %v950_v31  ;;  %v961_v35 = vadd.f32 %v960_v32, %v959_v30 }
 0x928   : > { %v985_v45 = vpop.permute.xlu0 %984 }
 0x929   : > { %1299 = vpush %v952_v34  ;;  %v962_v36 = vrot.slane %v961_v35, 1 }
 0x92b   : > { %v963_v37 = vadd.f32 %v962_v36, %v961_v35 }
 0x92d   : > { %1301 = vpush %v963_v37 }
 0x95a   : > { %s1300_s17 = spop %1299 }
 0x95b   : > { %s954_s20 = smul.f32 0.001953125, %s1300_s17 }
 0x95d   : > { %v968_v38 = vstv %s954_s20  ;;  %s966_s21 = smul.f32 %s954_s20, %s954_s20 }
 0x95e   : > { %s1302_s22 = spop %1301  ;;  %v969_v39 = vsub.f32 %v931_v11, %v968_v38  ;;  %v1017_v38 = vld [vmem:[%s1636_s13] sm:$0xff] }
 0x95f   : > { %s965_s23 = smul.f32 0.001953125, %s1302_s22 }
 0x961   : > { %s967_s24 = ssub.f32 %s965_s23, %s966_s21 }
 0x963   : > { %s970_s25 = sadd.f32 1e-05, %s967_s24  ;;  %s1662_s24 = smov 10  }
 0x965   : > { %v971_v40 = vstv %s970_s25 }
 0x966   : > { %1344 = vrsqrt.f32 %v971_v40 }
 0x970   : > { %v1345_v41 = vpop.eup %1344 }
 0x971   : > { %1303 = vpush %v1345_v41 }
 0x9a2   : > { %s1304_s0 = spop %1303 }
 0x9a3   : > { %v974_v42 = vstv %s1304_s0  ;;  %s1661_s0 = smov 11  }
 0x9a4   : > { %v975_v43 = vmul.f32 %v974_v42, %v969_v39 }
 0x9a6   : > { %v981_v1 = vmul.f32 %v979_v44, %v975_v43 }
 0x9a8   : > { %v987_v46 = vadd.f32 %v985_v45, %v981_v1 }
 0x9aa   : > { %v988_v47 = vmul.f32 %v1507_v23, %v987_v46 }
 0x9ac   : > { %v990_v48 = vmul.f32 0.70710677, %v988_v47  ;;  %v989_v8 = vmul.f32 0.5, %v988_v47 }
 0x9ae   : > { %v991_v49 = vand.u32 2147483647, %v990_v48  ;;  %vm1010_vm8 = vcmp.ge.f32.partialorder %v990_v48, 0.0 }
 0x9b0   : > { %v992_v50 = vmul.f32 0.3275911, %v991_v49  ;;  %v1004_v52 = vsub.f32 0.0, %v991_v49 }
 0x9b2   : > { %v993_v51 = vadd.f32 1.0, %v992_v50  ;;  %v1005_v54 = vmul.f32 %v1004_v52, %v991_v49 }
 0x9b4   : > { %1346 = vrcp.f32 %v993_v51  ;;  %v1006_v57 = vmul.f32 1.442695, %v1005_v54 }
 0x9b6   : > { %1348 = vpow2.f32 %v1006_v57 }
 0x9be   : > { %v1347_v53 = vpop.eup %1346 }
 0x9bf   : > { %v995_v55 = vmul.f32 1.0614054, %v1347_v53 }
 0x9c0   : > { %v1349_v3 = vpop.eup %1348 }
 0x9c1   : > { %v996_v56 = vadd.f32 -1.4531521, %v995_v55 }
 0x9c3   : > { %v997_v58 = vmul.f32 %v1347_v53, %v996_v56 }
 0x9c5   : > { %v998_v59 = vadd.f32 1.4214138, %v997_v58 }
 0x9c7   : > { %v999_v60 = vmul.f32 %v1347_v53, %v998_v59 }
 0x9c9   : > { %v1000_v61 = vadd.f32 -0.28449672, %v999_v60 }
 0x9cb   : > { %v1001_v62 = vmul.f32 %v1347_v53, %v1000_v61 }
 0x9cd   : > { %v1002_v63 = vadd.f32 0.2548296, %v1001_v62 }
 0x9cf   : > { %v1003_v2 = vmul.f32 %v1347_v53, %v1002_v63 }
 0x9d1   : > { %v1008_v4 = vmul.f32 %v1349_v3, %v1003_v2 }
 0x9d3   : > { %v1009_v5 = vsub.f32 1.0, %v1008_v4 }
 0x9d5   : > { %v1011_v6 = vsub.f32 0.0, %v1009_v5 }
 0x9d7   : > { %v1012_v7 = vsel %vm1010_vm8, %v1009_v5, %v1011_v6 }
 0x9d8   : > { %v1013_v9 = vadd.f32 1.0, %v1012_v7 }
 0x9da   : > { %v1014_v10 = vmul.f32 %v1013_v9, %v989_v8 }
 0x9dc   : > { %1022 = vrot.lane.b32.xlu0 %v1014_v10, %s1659_s27  ;;  %1018 = vrot.lane.b32.xlu1 %v1014_v10, %s1661_s0 }
 0x9e0   : > { %1026 = vrot.lane.b32.xlu0 %v1014_v10, %s1655_s28  ;;  %1020 = vrot.lane.b32.xlu1 %v1014_v10, %s1662_s24 }
 0x9e4   : > { %1030 = vrot.lane.b32.xlu0 %v1014_v10, %s1656_s29  ;;  %1024 = vrot.lane.b32.xlu1 %v1014_v10, %s1658_s26  ;;  %s1216_s29 = sshll.u32 %s1664_s19, 3 }
 0x9e5   : > { %s502_s17 = scalar_lea.vmem %s1637_s14, %s1216_s29 }
 0x9e6   : > { %v1137_v33 = vld [vmem:[%s502_s17] sm:$0xff]  ;;  %s506_s17 = scalar_lea.vmem %s1638_s15, %s1216_s29 }
 0x9e8   : > { %1028 = vrot.lane.b32.xlu1 %v1014_v10, %s1657_s30 }
 0x9ec   : > { %1032 = vrot.lane.b32.xlu1 %v1014_v10, %s1660_s16 }
 0xa4e   : > { %v1019_v11 = vpop.permute.xlu1 %1018  ;;  %v1023_v12 = vpop.permute.xlu0 %1022 }
 0xa52   : > { %v1021_v13 = vpop.permute.xlu1 %1020  ;;  %v1027_v17 = vpop.permute.xlu0 %1026 }
 0xa53   : > { %v1034_v14 = vpack.c.bf16 %v1021_v13, %v1019_v11  ;;  %v1036_v19 = vpack.c.bf16 %v1027_v17, %v1014_v10 }
 0xa55   : > { %1274 = vmatpush3.bf16.msra.mxu1 %v1034_v14 }
 0xa56   : > { %v1025_v15 = vpop.permute.xlu1 %1024  ;;  %1275 = vmatprep.subr.bf16.mxu1 %v1360_v0  ;;  %v1031_v20 = vpop.permute.xlu0 %1030 }
 0xa57   : > { %v1035_v16 = vpack.c.bf16 %v1025_v15, %v1023_v12 }
 0xa59   : > { %1276 = vmatpush3.bf16.msra.mxu1 %v1035_v16 }
 0xa5a   : > { %v1029_v18 = vpop.permute.xlu1 %1028  ;;  %1277 = vmatprep.subr.bf16.mxu1 %v1360_v0 }
 0xa5b   : > { %v1037_v22 = vpack.c.bf16 %v1031_v20, %v1029_v18 }
 0xa5d   : > { %1278 = vmatpush3.bf16.msra.mxu1 %v1036_v19 }
 0xa5e   : > { %v1033_v21 = vpop.permute.xlu1 %1032  ;;  %1279 = vmatprep.subr.bf16.mxu1 %v1360_v0 }
 0xa5f   : > { %v1038_v24 = vpack.c.bf16 %v1033_v21, %v1033_v21 }
 0xa61   : > { %1280 = vmatpush3.bf16.msra.mxu1 %v1037_v22  ;;  %v1044_v25 = vsel %vm541_vm1, %v1038_v24, 0 }
 0xa62   : > { %1281 = vmatprep.subr.bf16.mxu1 %v1360_v0  ;;  %v1016_v0 = vld [vmem:[%s1635_s12] sm:$0xff] }
 0xa65   : > { %1282 = vmatpush3.bf16.msra.mxu1 %v1044_v25 }
 0xa68   : > { %1284 = vmatmul.mubr.msk.bf16.vlgmr.msra.gmra.mrb[4].mxu1 %vm1039_vm9, %v1015_v26 }
 0xb3b   : > { %v1080_v27 = vpop.f32.mrb[4].mxu1 }
 0xb3c   : > { %v1285_v28 = vpop.f32.mrb[5].mxu1  ;;  %v1086_v29 = vmul.f32 %v1507_v23, %v1080_v27 }
 0xb3d   : > { %v1083_v30 = vpop.f32.mrb[6].mxu1 }
 0xb3e   : > { %1088 = vadd.xlane.f32.xlu0 %v1086_v29  ;;  %v1286_v31 = vpop.f32.mrb[7].mxu1  ;;  %v1087_v32 = vmul.f32 %v1086_v29, %v1086_v29 }
 0xb40   : > { %1090 = vadd.xlane.f32.xlu1 %v1087_v32 }
 0xb51   : > { %1126 = vperm.xlu1 %1331, %v1016_v0  }
 0xb55   : > { %1140 = vperm.xlu1 %1331, %v1137_v33  }
 0xbcb   : > { %v1089_v34 = vpop.xlane.xlu0 %1088 }
 0xbcc   : > { %v1092_v35 = vsel %vm943_vm7, %v1089_v34, 0.0 }
 0xbcd   : > { %1093 = vadd.xlane.f32.xlu0 %v1092_v35  ;;  %v1091_v36 = vpop.xlane.xlu1 %1090 }
 0xbce   : > { %v1103_v37 = vsel %vm943_vm7, %v1091_v36, 0.0 }
 0xbd1   : > { %1104 = vadd.xlane.f32.xlu0 %v1103_v37  ;;  %v1127_v58 = vpop.permute.xlu1 %1126 }
 0xbd5   : > { %v1141_v63 = vpop.permute.xlu1 %1140 }
 0xbe7   : > { %1132 = vperm.xlu0 %1330, %v1017_v38  }
 0xc5a   : > { %v1094_v39 = vpop.xlane.xlu0 %1093 }
 0xc5b   : > { %v1095_v40 = vrot.slane %v1094_v39, 4 }
 0xc5d   : > { %v1096_v41 = vadd.f32 %v1095_v40, %v1094_v39 }
 0xc5e   : > { %v1105_v42 = vpop.xlane.xlu0 %1104 }
 0xc5f   : > { %v1097_v43 = vrot.slane %v1096_v41, 2  ;;  %v1106_v44 = vrot.slane %v1105_v42, 4 }
 0xc61   : > { %v1107_v1 = vadd.f32 %v1106_v44, %v1105_v42  ;;  %v1098_v45 = vadd.f32 %v1097_v43, %v1096_v41 }
 0xc63   : > { %v1108_v46 = vrot.slane %v1107_v1, 2  ;;  %v1099_v47 = vrot.slane %v1098_v45, 1 }
 0xc65   : > { %v1100_v48 = vadd.f32 %v1099_v47, %v1098_v45  ;;  %v1109_v49 = vadd.f32 %v1108_v46, %v1107_v1 }
 0xc66   : > { %v1133_v60 = vpop.permute.xlu0 %1132 }
 0xc67   : > { %1305 = vpush %v1100_v48  ;;  %v1110_v50 = vrot.slane %v1109_v49, 1 }
 0xc69   : > { %v1111_v51 = vadd.f32 %v1110_v50, %v1109_v49 }
 0xc6b   : > { %1307 = vpush %v1111_v51 }
 0xc98   : > { %s1306_s22 = spop %1305 }
 0xc99   : > { %s1102_s23 = smul.f32 0.001953125, %s1306_s22 }
 0xc9b   : > { %v1116_v52 = vstv %s1102_s23  ;;  %s1114_s0 = smul.f32 %s1102_s23, %s1102_s23 }
 0xc9c   : > { %s1308_s24 = spop %1307  ;;  %v1117_v53 = vsub.f32 %v1080_v27, %v1116_v52 }
 0xc9d   : > { %s1113_s25 = smul.f32 0.001953125, %s1308_s24 }
 0xc9f   : > { %s1115_s28 = ssub.f32 %s1113_s25, %s1114_s0 }
 0xca1   : > { %s1118_s30 = sadd.f32 1e-05, %s1115_s28 }
 0xca3   : > { %v1119_v54 = vstv %s1118_s30 }
 0xca4   : > { %1350 = vrsqrt.f32 %v1119_v54 }
 0xcae   : > { %v1351_v55 = vpop.eup %1350 }
 0xcaf   : > { %1309 = vpush %v1351_v55 }
 0xce0   : > { %s1310_s26 = spop %1309 }
 0xce1   : > { %v1122_v56 = vstv %s1310_s26 }
 0xce2   : > { %v1123_v57 = vmul.f32 %v1122_v56, %v1117_v53 }
 0xce4   : > { %v1129_v59 = vmul.f32 %v1127_v58, %v1123_v57 }
 0xce6   : > { %v1135_v61 = vadd.f32 %v1133_v60, %v1129_v59 }
 0xce8   : > { %v1136_v62 = vmul.f32 %v1507_v23, %v1135_v61 }
 0xcea   : > { %v1143_v2 = vadd.f32 %v1141_v63, %v1136_v62 }
 0xcec   : > { %1144 = vst [vmem:[%s506_s17] sm:$0xff] %v1143_v2 }
 0xced PF: > { %s25_s18 = sadd.s32 1, %s1358_s18  }
 0xcee   : > { %p22_p4 = scmp.ge.s32.totalorder %s25_s18, 4  }
 0xcf0   :  { %24 = sbr.rel (!%p22_p4) target bundleno = 2 (0x2), region = 113 }

</bundles_post_ra>
